<compile_context>
chip_gen: v5e
topology: v5e:2x2
jax: 0.10.0
libtpu: 0.0.40
codegen_flags: <defaults>
</compile_context>

<pallas_src>
import functools

import jax
import jax.numpy as jnp
from jax import lax
from jax.experimental import pallas as pl
from jax.experimental.pallas import tpu as pltpu


def _digit_caps_kernel(u_ref, w_ref, v_ref, *, routing, J, D, K):
    """One grid step = one batch element.

    u_ref : [1, K, R1]      input capsules, transposed so R1 is the lane dim
    w_ref : [K, J, D, R1]   routing weights, W[k, j, d, i] = W_torch[0, i, j, k, d]
    v_ref : [1, J, D]       output digit capsules
    """
    f32 = jnp.float32
    u_b = u_ref[0].astype(f32)                                   # [K, R1]
    R1 = u_b.shape[1]

    # ---- u_hat[j, d, i] = sum_k u[i, k] * W[i, j, k, d]  (8 VPU FMAs) -------
    u_hat = u_b[0][None, None, :] * w_ref[0].astype(f32)         # [J, D, R1]
    for k in range(1, K):
        u_hat = u_hat + u_b[k][None, None, :] * w_ref[k].astype(f32)

    # ---- dynamic routing ----------------------------------------------------
    b = jnp.zeros((J, R1), f32)
    v = jnp.zeros((J, D), f32)
    for r in range(routing):
        # c = softmax over classes (axis 0 = J)
        b_max = jnp.max(b, axis=0, keepdims=True)                # [1, R1]
        e = jnp.exp(b - b_max)
        c = e / jnp.sum(e, axis=0, keepdims=True)                # [J, R1]

        # s_j = sum_i c[j,i] * u_hat[j,:,i]
        s = jnp.sum(c[:, None, :] * u_hat, axis=2)               # [J, D]

        # squash: v = (||s||^2 / (1+||s||^2)) * s/||s||  ==  sqrt(sq)/(1+sq) * s
        sq = jnp.sum(s * s, axis=1, keepdims=True)               # [J, 1]
        factor = jnp.sqrt(sq) / (1.0 + sq)                       # safe at s == 0
        v = factor * s                                           # [J, D]

        if r + 1 < routing:                                      # b unused after last iter
            b = b + jnp.sum(u_hat * v[:, :, None], axis=1)       # [J, R1]

    v_ref[0] = v.astype(v_ref.dtype)


def digit_caps_forward(u, W, routing=3):
    """u: [B, R1, 8], W: [1, R1, J, 8, 16] (PyTorch parameter layout). Returns [B, J, 16]."""
    B, R1, K = u.shape
    Wq = W[0]                                                    # [R1, J, K, D]
    J, D = Wq.shape[1], Wq.shape[3]

    # Layout glue: put R1 on the lane (last) dim for both operands.
    u_k = jnp.transpose(u, (0, 2, 1)).astype(jnp.float32)        # [B, K, R1]
    w_k = jnp.transpose(Wq, (2, 1, 3, 0)).astype(jnp.float32)    # [K, J, D, R1]

    kernel = functools.partial(_digit_caps_kernel, routing=routing, J=J, D=D, K=K)

    v = pl.pallas_call(
        kernel,
        out_shape=jax.ShapeDtypeStruct((B, J, D), jnp.float32),
        grid_spec=pltpu.PrefetchScalarGridSpec(
            num_scalar_prefetch=0,
            grid=(B,),
            in_specs=[
                pl.BlockSpec((1, K, R1), lambda i: (i, 0, 0)),
                # Weights: constant index_map -> resident, fetched once.
                pl.BlockSpec((K, J, D, R1), lambda i: (0, 0, 0, 0)),
            ],
            out_specs=pl.BlockSpec((1, J, D), lambda i: (i, 0, 0)),
        ),
        compiler_params=pltpu.CompilerParams(
            dimension_semantics=("parallel",)),                  # batch axis -> both TCs on v7x
    )(u_k, w_k)
    return v


def digit_caps_reference(u, W, routing=3):
    """Pure-JAX reference mirroring the PyTorch forward exactly."""
    u_hat = jnp.einsum('brk,rjkd->brjd', u, W[0],
                       precision=lax.Precision.HIGHEST)          # [B, R1, J, D]
    B, R1, J, D = u_hat.shape
    b = jnp.zeros((B, R1, J, 1), u_hat.dtype)
    v = jnp.zeros((B, J, D), u_hat.dtype)
    for _ in range(routing):
        c = jax.nn.softmax(b, axis=2)                            # [B, R1, J, 1]
        s = jnp.sum(u_hat * c, axis=1)                           # [B, J, D]
        sq = jnp.sum(s * s, axis=2)
        norm = jnp.sqrt(sq)
        factor = norm ** 2 / (norm * (1.0 + norm ** 2))
        v = factor[..., None] * s
        b = b + jnp.sum(u_hat * v[:, None, :, :], axis=3, keepdims=True)
    return v


if __name__ == "__main__":
    key = jax.random.PRNGKey(0)
    k_u, k_w = jax.random.split(key)

    # Small shapes: batch=2, in_resolution=128 input capsules, 10 classes, 3 routing iters.
    B, R1, J, K, D = 2, 128, 10, 8, 16
    routing = 3

    u = jax.random.normal(k_u, (B, R1, K), jnp.float32)
    W = jax.random.normal(k_w, (1, R1, J, K, D), jnp.float32)    # like torch.randn

    fwd = jax.jit(functools.partial(digit_caps_forward, routing=routing))
    v = jax.block_until_ready(fwd(u, W))
    assert v.shape == (B, J, D), (v.shape, (B, J, D))

    ref = jax.jit(functools.partial(digit_caps_reference, routing=routing))
    v_ref = jax.block_until_ready(ref(u, W))
    max_err = float(jnp.max(jnp.abs(v - v_ref)))
    assert max_err < 5e-3, f"max abs err too large: {max_err}"

    print("KERNEL_OK")
</pallas_src>

<mosaic_0001>
module attributes {stable_mosaic.version = 11 : i64} {
  func.func @_digit_caps_kernel(%arg0: i32, %arg1: memref<1x8x128xf32, #tpu.memory_space<vmem>>, %arg2: memref<8x10x16x128xf32, #tpu.memory_space<vmem>>, %arg3: memref<1x10x16xf32, #tpu.memory_space<vmem>>) attributes {dimension_semantics = [#tpu.dimension_semantics<parallel>], iteration_bounds = array<i64: 2>, scalar_prefetch = 0 : i64, scratch_operands = 0 : i64, tpu.core_type = #tpu.core_type<tc>, window_params = [{transform_indices = @transform_0, window_bounds = array<i64: 1, 8, 128>}, {pipeline_mode = #tpu.pipeline_mode<synchronous>, transform_indices = @transform_1, window_bounds = array<i64: 8, 10, 16, 128>}, {transform_indices = @transform_2, window_bounds = array<i64: 1, 10, 16>}]} {
    %c0 = arith.constant 0 : index
    %c0_0 = arith.constant 0 : index
    %c0_1 = arith.constant 0 : index
    %0 = vector.load %arg1[%c0, %c0_0, %c0_1] : memref<1x8x128xf32, #tpu.memory_space<vmem>>, vector<1x8x128xf32>
    %1 = vector.shape_cast %0 : vector<1x8x128xf32> to vector<8x128xf32>
    %2 = vector.extract_strided_slice %1 {offsets = [0, 0], sizes = [1, 128], strides = [1, 1]} : vector<8x128xf32> to vector<1x128xf32>
    %3 = vector.shape_cast %2 : vector<1x128xf32> to vector<128xf32>
    %4 = vector.shape_cast %3 : vector<128xf32> to vector<1x1x128xf32>
    %c0_2 = arith.constant 0 : index
    %c0_3 = arith.constant 0 : index
    %c0_4 = arith.constant 0 : index
    %c0_5 = arith.constant 0 : index
    %5 = vector.load %arg2[%c0_2, %c0_3, %c0_4, %c0_5] : memref<8x10x16x128xf32, #tpu.memory_space<vmem>>, vector<1x10x16x128xf32>
    %6 = vector.shape_cast %5 : vector<1x10x16x128xf32> to vector<10x16x128xf32>
    %7 = vector.broadcast %4 : vector<1x1x128xf32> to vector<10x16x128xf32>
    %8 = arith.mulf %7, %6 : vector<10x16x128xf32>
    %9 = vector.extract_strided_slice %1 {offsets = [1, 0], sizes = [1, 128], strides = [1, 1]} : vector<8x128xf32> to vector<1x128xf32>
    %10 = vector.shape_cast %9 : vector<1x128xf32> to vector<128xf32>
    %11 = vector.shape_cast %10 : vector<128xf32> to vector<1x1x128xf32>
    %c1 = arith.constant 1 : index
    %c0_6 = arith.constant 0 : index
    %c0_7 = arith.constant 0 : index
    %c0_8 = arith.constant 0 : index
    %12 = vector.load %arg2[%c1, %c0_6, %c0_7, %c0_8] : memref<8x10x16x128xf32, #tpu.memory_space<vmem>>, vector<1x10x16x128xf32>
    %13 = vector.shape_cast %12 : vector<1x10x16x128xf32> to vector<10x16x128xf32>
    %14 = vector.broadcast %11 : vector<1x1x128xf32> to vector<10x16x128xf32>
    %15 = arith.mulf %14, %13 : vector<10x16x128xf32>
    %16 = arith.addf %8, %15 : vector<10x16x128xf32>
    %17 = vector.extract_strided_slice %1 {offsets = [2, 0], sizes = [1, 128], strides = [1, 1]} : vector<8x128xf32> to vector<1x128xf32>
    %18 = vector.shape_cast %17 : vector<1x128xf32> to vector<128xf32>
    %19 = vector.shape_cast %18 : vector<128xf32> to vector<1x1x128xf32>
    %c2 = arith.constant 2 : index
    %c0_9 = arith.constant 0 : index
    %c0_10 = arith.constant 0 : index
    %c0_11 = arith.constant 0 : index
    %20 = vector.load %arg2[%c2, %c0_9, %c0_10, %c0_11] : memref<8x10x16x128xf32, #tpu.memory_space<vmem>>, vector<1x10x16x128xf32>
    %21 = vector.shape_cast %20 : vector<1x10x16x128xf32> to vector<10x16x128xf32>
    %22 = vector.broadcast %19 : vector<1x1x128xf32> to vector<10x16x128xf32>
    %23 = arith.mulf %22, %21 : vector<10x16x128xf32>
    %24 = arith.addf %16, %23 : vector<10x16x128xf32>
    %25 = vector.extract_strided_slice %1 {offsets = [3, 0], sizes = [1, 128], strides = [1, 1]} : vector<8x128xf32> to vector<1x128xf32>
    %26 = vector.shape_cast %25 : vector<1x128xf32> to vector<128xf32>
    %27 = vector.shape_cast %26 : vector<128xf32> to vector<1x1x128xf32>
    %c3 = arith.constant 3 : index
    %c0_12 = arith.constant 0 : index
    %c0_13 = arith.constant 0 : index
    %c0_14 = arith.constant 0 : index
    %28 = vector.load %arg2[%c3, %c0_12, %c0_13, %c0_14] : memref<8x10x16x128xf32, #tpu.memory_space<vmem>>, vector<1x10x16x128xf32>
    %29 = vector.shape_cast %28 : vector<1x10x16x128xf32> to vector<10x16x128xf32>
    %30 = vector.broadcast %27 : vector<1x1x128xf32> to vector<10x16x128xf32>
    %31 = arith.mulf %30, %29 : vector<10x16x128xf32>
    %32 = arith.addf %24, %31 : vector<10x16x128xf32>
    %33 = vector.extract_strided_slice %1 {offsets = [4, 0], sizes = [1, 128], strides = [1, 1]} : vector<8x128xf32> to vector<1x128xf32>
    %34 = vector.shape_cast %33 : vector<1x128xf32> to vector<128xf32>
    %35 = vector.shape_cast %34 : vector<128xf32> to vector<1x1x128xf32>
    %c4 = arith.constant 4 : index
    %c0_15 = arith.constant 0 : index
    %c0_16 = arith.constant 0 : index
    %c0_17 = arith.constant 0 : index
    %36 = vector.load %arg2[%c4, %c0_15, %c0_16, %c0_17] : memref<8x10x16x128xf32, #tpu.memory_space<vmem>>, vector<1x10x16x128xf32>
    %37 = vector.shape_cast %36 : vector<1x10x16x128xf32> to vector<10x16x128xf32>
    %38 = vector.broadcast %35 : vector<1x1x128xf32> to vector<10x16x128xf32>
    %39 = arith.mulf %38, %37 : vector<10x16x128xf32>
    %40 = arith.addf %32, %39 : vector<10x16x128xf32>
    %41 = vector.extract_strided_slice %1 {offsets = [5, 0], sizes = [1, 128], strides = [1, 1]} : vector<8x128xf32> to vector<1x128xf32>
    %42 = vector.shape_cast %41 : vector<1x128xf32> to vector<128xf32>
    %43 = vector.shape_cast %42 : vector<128xf32> to vector<1x1x128xf32>
    %c5 = arith.constant 5 : index
    %c0_18 = arith.constant 0 : index
    %c0_19 = arith.constant 0 : index
    %c0_20 = arith.constant 0 : index
    %44 = vector.load %arg2[%c5, %c0_18, %c0_19, %c0_20] : memref<8x10x16x128xf32, #tpu.memory_space<vmem>>, vector<1x10x16x128xf32>
    %45 = vector.shape_cast %44 : vector<1x10x16x128xf32> to vector<10x16x128xf32>
    %46 = vector.broadcast %43 : vector<1x1x128xf32> to vector<10x16x128xf32>
    %47 = arith.mulf %46, %45 : vector<10x16x128xf32>
    %48 = arith.addf %40, %47 : vector<10x16x128xf32>
    %49 = vector.extract_strided_slice %1 {offsets = [6, 0], sizes = [1, 128], strides = [1, 1]} : vector<8x128xf32> to vector<1x128xf32>
    %50 = vector.shape_cast %49 : vector<1x128xf32> to vector<128xf32>
    %51 = vector.shape_cast %50 : vector<128xf32> to vector<1x1x128xf32>
    %c6 = arith.constant 6 : index
    %c0_21 = arith.constant 0 : index
    %c0_22 = arith.constant 0 : index
    %c0_23 = arith.constant 0 : index
    %52 = vector.load %arg2[%c6, %c0_21, %c0_22, %c0_23] : memref<8x10x16x128xf32, #tpu.memory_space<vmem>>, vector<1x10x16x128xf32>
    %53 = vector.shape_cast %52 : vector<1x10x16x128xf32> to vector<10x16x128xf32>
    %54 = vector.broadcast %51 : vector<1x1x128xf32> to vector<10x16x128xf32>
    %55 = arith.mulf %54, %53 : vector<10x16x128xf32>
    %56 = arith.addf %48, %55 : vector<10x16x128xf32>
    %57 = vector.extract_strided_slice %1 {offsets = [7, 0], sizes = [1, 128], strides = [1, 1]} : vector<8x128xf32> to vector<1x128xf32>
    %58 = vector.shape_cast %57 : vector<1x128xf32> to vector<128xf32>
    %59 = vector.shape_cast %58 : vector<128xf32> to vector<1x1x128xf32>
    %c7 = arith.constant 7 : index
    %c0_24 = arith.constant 0 : index
    %c0_25 = arith.constant 0 : index
    %c0_26 = arith.constant 0 : index
    %60 = vector.load %arg2[%c7, %c0_24, %c0_25, %c0_26] : memref<8x10x16x128xf32, #tpu.memory_space<vmem>>, vector<1x10x16x128xf32>
    %61 = vector.shape_cast %60 : vector<1x10x16x128xf32> to vector<10x16x128xf32>
    %62 = vector.broadcast %59 : vector<1x1x128xf32> to vector<10x16x128xf32>
    %63 = arith.mulf %62, %61 : vector<10x16x128xf32>
    %64 = arith.addf %56, %63 : vector<10x16x128xf32>
    %cst = arith.constant 0.000000e+00 : f32
    %65 = vector.broadcast %cst : f32 to vector<10x128xf32>
    %cst_27 = arith.constant dense<0xFF800000> : vector<128xf32>
    %66 = vector.multi_reduction <maximumf>, %65, %cst_27 [0] : vector<10x128xf32> to vector<128xf32>
    %67 = vector.shape_cast %66 : vector<128xf32> to vector<1x128xf32>
    %68 = vector.broadcast %67 : vector<1x128xf32> to vector<10x128xf32>
    %69 = arith.subf %65, %68 : vector<10x128xf32>
    %70 = math.exp %69 : vector<10x128xf32>
    %cst_28 = arith.constant dense<0.000000e+00> : vector<128xf32>
    %71 = vector.multi_reduction <add>, %70, %cst_28 [0] : vector<10x128xf32> to vector<128xf32>
    %72 = vector.shape_cast %71 : vector<128xf32> to vector<1x128xf32>
    %73 = vector.broadcast %72 : vector<1x128xf32> to vector<10x128xf32>
    %74 = arith.divf %70, %73 : vector<10x128xf32>
    %75 = vector.shape_cast %74 : vector<10x128xf32> to vector<10x1x128xf32>
    %76 = vector.broadcast %75 : vector<10x1x128xf32> to vector<10x16x128xf32>
    %77 = arith.mulf %76, %64 : vector<10x16x128xf32>
    %cst_29 = arith.constant dense<0.000000e+00> : vector<10x16xf32>
    %78 = vector.multi_reduction <add>, %77, %cst_29 [2] : vector<10x16x128xf32> to vector<10x16xf32>
    %79 = arith.mulf %78, %78 : vector<10x16xf32>
    %cst_30 = arith.constant dense<0.000000e+00> : vector<10xf32>
    %80 = vector.multi_reduction <add>, %79, %cst_30 [1] : vector<10x16xf32> to vector<10xf32>
    %81 = vector.shape_cast %80 : vector<10xf32> to vector<10x1xf32>
    %82 = math.sqrt %81 : vector<10x1xf32>
    %cst_31 = arith.constant 1.000000e+00 : f32
    %83 = vector.broadcast %cst_31 : f32 to vector<10x1xf32>
    %84 = arith.addf %83, %81 : vector<10x1xf32>
    %85 = arith.divf %82, %84 : vector<10x1xf32>
    %86 = vector.broadcast %85 : vector<10x1xf32> to vector<10x16xf32>
    %87 = arith.mulf %86, %78 : vector<10x16xf32>
    %88 = vector.shape_cast %87 : vector<10x16xf32> to vector<10x16x1xf32>
    %89 = vector.broadcast %88 : vector<10x16x1xf32> to vector<10x16x128xf32>
    %90 = arith.mulf %64, %89 : vector<10x16x128xf32>
    %cst_32 = arith.constant dense<0.000000e+00> : vector<10x128xf32>
    %91 = vector.multi_reduction <add>, %90, %cst_32 [1] : vector<10x16x128xf32> to vector<10x128xf32>
    %92 = arith.addf %65, %91 : vector<10x128xf32>
    %cst_33 = arith.constant dense<0xFF800000> : vector<128xf32>
    %93 = vector.multi_reduction <maximumf>, %92, %cst_33 [0] : vector<10x128xf32> to vector<128xf32>
    %94 = vector.shape_cast %93 : vector<128xf32> to vector<1x128xf32>
    %95 = vector.broadcast %94 : vector<1x128xf32> to vector<10x128xf32>
    %96 = arith.subf %92, %95 : vector<10x128xf32>
    %97 = math.exp %96 : vector<10x128xf32>
    %cst_34 = arith.constant dense<0.000000e+00> : vector<128xf32>
    %98 = vector.multi_reduction <add>, %97, %cst_34 [0] : vector<10x128xf32> to vector<128xf32>
    %99 = vector.shape_cast %98 : vector<128xf32> to vector<1x128xf32>
    %100 = vector.broadcast %99 : vector<1x128xf32> to vector<10x128xf32>
    %101 = arith.divf %97, %100 : vector<10x128xf32>
    %102 = vector.shape_cast %101 : vector<10x128xf32> to vector<10x1x128xf32>
    %103 = vector.broadcast %102 : vector<10x1x128xf32> to vector<10x16x128xf32>
    %104 = arith.mulf %103, %64 : vector<10x16x128xf32>
    %cst_35 = arith.constant dense<0.000000e+00> : vector<10x16xf32>
    %105 = vector.multi_reduction <add>, %104, %cst_35 [2] : vector<10x16x128xf32> to vector<10x16xf32>
    %106 = arith.mulf %105, %105 : vector<10x16xf32>
    %cst_36 = arith.constant dense<0.000000e+00> : vector<10xf32>
    %107 = vector.multi_reduction <add>, %106, %cst_36 [1] : vector<10x16xf32> to vector<10xf32>
    %108 = vector.shape_cast %107 : vector<10xf32> to vector<10x1xf32>
    %109 = math.sqrt %108 : vector<10x1xf32>
    %cst_37 = arith.constant 1.000000e+00 : f32
    %110 = vector.broadcast %cst_37 : f32 to vector<10x1xf32>
    %111 = arith.addf %110, %108 : vector<10x1xf32>
    %112 = arith.divf %109, %111 : vector<10x1xf32>
    %113 = vector.broadcast %112 : vector<10x1xf32> to vector<10x16xf32>
    %114 = arith.mulf %113, %105 : vector<10x16xf32>
    %115 = vector.shape_cast %114 : vector<10x16xf32> to vector<10x16x1xf32>
    %116 = vector.broadcast %115 : vector<10x16x1xf32> to vector<10x16x128xf32>
    %117 = arith.mulf %64, %116 : vector<10x16x128xf32>
    %cst_38 = arith.constant dense<0.000000e+00> : vector<10x128xf32>
    %118 = vector.multi_reduction <add>, %117, %cst_38 [1] : vector<10x16x128xf32> to vector<10x128xf32>
    %119 = arith.addf %92, %118 : vector<10x128xf32>
    %cst_39 = arith.constant dense<0xFF800000> : vector<128xf32>
    %120 = vector.multi_reduction <maximumf>, %119, %cst_39 [0] : vector<10x128xf32> to vector<128xf32>
    %121 = vector.shape_cast %120 : vector<128xf32> to vector<1x128xf32>
    %122 = vector.broadcast %121 : vector<1x128xf32> to vector<10x128xf32>
    %123 = arith.subf %119, %122 : vector<10x128xf32>
    %124 = math.exp %123 : vector<10x128xf32>
    %cst_40 = arith.constant dense<0.000000e+00> : vector<128xf32>
    %125 = vector.multi_reduction <add>, %124, %cst_40 [0] : vector<10x128xf32> to vector<128xf32>
    %126 = vector.shape_cast %125 : vector<128xf32> to vector<1x128xf32>
    %127 = vector.broadcast %126 : vector<1x128xf32> to vector<10x128xf32>
    %128 = arith.divf %124, %127 : vector<10x128xf32>
    %129 = vector.shape_cast %128 : vector<10x128xf32> to vector<10x1x128xf32>
    %130 = vector.broadcast %129 : vector<10x1x128xf32> to vector<10x16x128xf32>
    %131 = arith.mulf %130, %64 : vector<10x16x128xf32>
    %cst_41 = arith.constant dense<0.000000e+00> : vector<10x16xf32>
    %132 = vector.multi_reduction <add>, %131, %cst_41 [2] : vector<10x16x128xf32> to vector<10x16xf32>
    %133 = arith.mulf %132, %132 : vector<10x16xf32>
    %cst_42 = arith.constant dense<0.000000e+00> : vector<10xf32>
    %134 = vector.multi_reduction <add>, %133, %cst_42 [1] : vector<10x16xf32> to vector<10xf32>
    %135 = vector.shape_cast %134 : vector<10xf32> to vector<10x1xf32>
    %136 = math.sqrt %135 : vector<10x1xf32>
    %cst_43 = arith.constant 1.000000e+00 : f32
    %137 = vector.broadcast %cst_43 : f32 to vector<10x1xf32>
    %138 = arith.addf %137, %135 : vector<10x1xf32>
    %139 = arith.divf %136, %138 : vector<10x1xf32>
    %140 = vector.broadcast %139 : vector<10x1xf32> to vector<10x16xf32>
    %141 = arith.mulf %140, %132 : vector<10x16xf32>
    %c0_44 = arith.constant 0 : index
    %c0_45 = arith.constant 0 : index
    %c0_46 = arith.constant 0 : index
    %142 = vector.load %arg3[%c0_44, %c0_45, %c0_46] : memref<1x10x16xf32, #tpu.memory_space<vmem>>, vector<1x10x16xf32>
    %143 = vector.shape_cast %142 : vector<1x10x16xf32> to vector<10x16xf32>
    %144 = vector.shape_cast %141 : vector<10x16xf32> to vector<1x10x16xf32>
    tpu.vector_store %arg3[%c0_44, %c0_45, %c0_46], %144 {strides = array<i32>} : memref<1x10x16xf32, #tpu.memory_space<vmem>>, vector<1x10x16xf32>,
    return
  }
  func.func @transform_0(%arg0: i32) -> (i32, i32, i32) {
    %c0_i32 = arith.constant 0 : i32
    %c0_i32_0 = arith.constant 0 : i32
    %c0_i32_1 = arith.constant 0 : i32
    return %arg0, %c0_i32, %c0_i32_0 : i32, i32, i32
  }
  func.func @transform_1(%arg0: i32) -> (i32, i32, i32, i32) {
    %c0_i32 = arith.constant 0 : i32
    %c0_i32_0 = arith.constant 0 : i32
    %c0_i32_1 = arith.constant 0 : i32
    %c0_i32_2 = arith.constant 0 : i32
    %c0_i32_3 = arith.constant 0 : i32
    return %c0_i32, %c0_i32_0, %c0_i32_1, %c0_i32_2 : i32, i32, i32, i32
  }
  func.func @transform_2(%arg0: i32) -> (i32, i32, i32) {
    %c0_i32 = arith.constant 0 : i32
    %c0_i32_0 = arith.constant 0 : i32
    %c0_i32_1 = arith.constant 0 : i32
    return %arg0, %c0_i32, %c0_i32_0 : i32, i32, i32
  }
}

</mosaic_0001>

<bundles_post_ra>
// kernel: digit_caps_forward.1
= control target key start
LH: loop header
LB: loop body
LE: loop exit
PB: predicated region body
PF: predicated region fallthrough
CT: control target
= control target key end

     0   :  { %s2459_s9 = smov 0   ;;  %s3765_s0 = inlined_call_operand.vmem [shape: f32[2,8,128], index: 0, kind: input, shape index: {}]   ;;  %s3766_s1 = inlined_call_operand.vmem [shape: f32[8,10,16,128], index: 1, kind: input, shape index: {}]   ;;  %s3767_s2 = inlined_call_operand.vmem [shape: f32[2,10,16], index: 2, kind: output, shape index: {}]  }
   0x1 LB: > { %s2183_s10 = sadd.s32 4294967295, %s2441_s9   ;;  %p2187_p0 = scmp.ge.s32.totalorder %s2441_s9, 1  ;;  %s2441_s9 = sphi %s2459_s9, %s12_s9  }
   0x2   : > { %p111_p1 = scmp.lt.s32.totalorder %s2441_s9, 3 }
   0x4   : > { %p112_p2 = pnand %p2187_p0, %p111_p1 }
   0x6   : > { %115 = sbr.rel (%p112_p2) target bundleno = 1556 (0x614), region = 28 }
   0xb   : > { %p132_p3 = scmp.lt.s32.totalorder %s2183_s10, 1  ;;  %vm617_vm0 = vcmask 1041408   ;;  %v2443_v0 = vmov 0.0   ;;  %v146_v4 = vld [vmem:[%s3766_s1 + $0x20] sm:$0xff]  ;;  %v144_v18 = vld [vmem:[%s3766_s1 + $0x10] sm:$0xff]  ;;  %v147_v58 = vld [vmem:[%s3766_s1 + $0x28] sm:$0xff] }
   0xc   : > { %v618_v1 = vsel %vm617_vm0, 1.0, %v2443_v0  ;;  %v2195_v6 = vld [vmem:[%s3766_s1 + $0xc0] sm:$0xff]  ;;  %v2193_v19 = vld [vmem:[%s3766_s1 + $0xb0] sm:$0xff]  ;;  %v2196_v59 = vld [vmem:[%s3766_s1 + $0xc8] sm:$0xff]  ;;  %vm746_vm5 = vcmask 130112   ;;  %vm775_vm6 = vcmask 1041409  }
   0xd   : > { %s3800_s10 = smov (!%p132_p3, %s2183_s10), 1  ;;  %v619_v2 = vadd.f32 1.0, %v618_v1  ;;  %v2215_v7 = vld [vmem:[%s3766_s1 + $0x160] sm:$0xff]  ;;  %v2213_v25 = vld [vmem:[%s3766_s1 + $0x150] sm:$0xff]  ;;  %v2216_v60 = vld [vmem:[%s3766_s1 + $0x168] sm:$0xff]  ;;  %vm777_vm7 = vcmask 1042434  }
   0xe   : > { %s2188_s11 = sshll.u32 %s3800_s10, 3  ;;  %v2235_v12 = vld [vmem:[%s3766_s1 + $0x200] sm:$0xff]  ;;  %v2233_v29 = vld [vmem:[%s3766_s1 + $0x1f0] sm:$0xff]  ;;  %vm779_vm8 = vcmask 1043459   ;;  %vm781_vm9 = vcmask 1044484   ;;  %vm783_vm10 = vcmask 1045509  }
   0xf   : > { %v620_v3 = vrot.slane %v619_v2, 4  ;;  %s135_s14 = scalar_lea.vmem %s3765_s0, %s2188_s11  ;;  %v2255_v14 = vld [vmem:[%s3766_s1 + $0x2a0] sm:$0xff]  ;;  %v2253_v41 = vld [vmem:[%s3766_s1 + $0x290] sm:$0xff]  ;;  %vm785_vm11 = vcmask 1046534   ;;  %vm787_vm12 = vcmask 1047559   ;;  %vm3769_vm13 = vcmask 130048  }
  0x10   : > { %v141_v5 = vld [vmem:[%s135_s14] sm:$0xff]  ;;  %v2273_v46 = vld [vmem:[%s3766_s1 + $0x330] sm:$0xff]  ;;  %vm3768_vm14 = vcmask 123904   ;;  %s2333_s23 = sshll.u32 %s3800_s10, 4 }
  0x11   : > { %v621_v8 = vadd.f32 %v620_v3, %v619_v2  ;;  %v2483_v9 = vperm.slane %v141_v5, 0  ;;  %v2485_v10 = vperm.slane %v141_v5, 1  ;;  %v2487_v11 = vperm.slane %v141_v5, 2  ;;  %v2275_v23 = vld [vmem:[%s3766_s1 + $0x340] sm:$0xff]  ;;  %v2293_v47 = vld [vmem:[%s3766_s1 + $0x3d0] sm:$0xff]  ;;  %s140_s26 = scalar_lea.vmem %s3767_s2, %s2333_s23 }
  0x12   : > { %v2492_v13 = vperm.slane %v141_v5, 3  ;;  %v2497_v15 = vperm.slane %v141_v5, 4  ;;  %v2499_v16 = vperm.slane %v141_v5, 5  ;;  %v2501_v17 = vperm.slane %v141_v5, 6  ;;  %v2295_v24 = vld [vmem:[%s3766_s1 + $0x3e0] sm:$0xff] }
  0x13   : > { %v167_v20 = vmul.f32 %v2483_v9, %v146_v4  ;;  %v209_v21 = vmul.f32 %v2195_v6, %v2485_v10  ;;  %v271_v22 = vmul.f32 %v2215_v7, %v2487_v11  ;;  %v2315_v27 = vld [vmem:[%s3766_s1 + $0x480] sm:$0xff]  ;;  %v2525_v28 = vperm.slane %v141_v5, 7  ;;  %v2313_v6 = vld [vmem:[%s3766_s1 + $0x470] sm:$0xff] }
  0x14   : > { %v333_v26 = vmul.f32 %v2235_v12, %v2492_v13  ;;  %v622_v31 = vrot.slane %v621_v8, 2  ;;  %v165_v32 = vmul.f32 %v2483_v9, %v144_v18  ;;  %v207_v33 = vmul.f32 %v2193_v19, %v2485_v10  ;;  %v142_v34 = vld [vmem:[%s3766_s1] sm:$0xff]  ;;  %v2236_v19 = vld [vmem:[%s3766_s1 + $0x208] sm:$0xff] }
  0x15   : > { %v229_v30 = vadd.f32 %v209_v21, %v167_v20  ;;  %v2191_v35 = vld [vmem:[%s3766_s1 + $0xa0] sm:$0xff]  ;;  %v395_v37 = vmul.f32 %v2255_v14, %v2497_v15  ;;  %v457_v38 = vmul.f32 %v2275_v23, %v2499_v16  ;;  %v519_v39 = vmul.f32 %v2295_v24, %v2501_v17 }
  0x16   : > { %v2211_v36 = vld [vmem:[%s3766_s1 + $0x140] sm:$0xff]  ;;  %v269_v40 = vmul.f32 %v2213_v25, %v2487_v11  ;;  %v623_v43 = vadd.f32 %v622_v31, %v621_v8  ;;  %v227_v44 = vadd.f32 %v207_v33, %v165_v32  ;;  %v331_v45 = vmul.f32 %v2233_v29, %v2492_v13  ;;  %v2256_v29 = vld [vmem:[%s3766_s1 + $0x2a8] sm:$0xff] }
  0x17   : > { %v291_v42 = vadd.f32 %v271_v22, %v229_v30  ;;  %v2231_v48 = vld [vmem:[%s3766_s1 + $0x1e0] sm:$0xff]  ;;  %v581_v49 = vmul.f32 %v2315_v27, %v2525_v28  ;;  %v163_v50 = vmul.f32 %v2483_v9, %v142_v34  ;;  %v205_v51 = vmul.f32 %v2191_v35, %v2485_v10  ;;  %v2276_v34 = vld [vmem:[%s3766_s1 + $0x348] sm:$0xff]  ;;  %v145_v35 = vld [vmem:[%s3766_s1 + $0x18] sm:$0xff] }
  0x18   : > { %v267_v52 = vmul.f32 %v2211_v36, %v2487_v11  ;;  %v2251_v53 = vld [vmem:[%s3766_s1 + $0x280] sm:$0xff]  ;;  %v624_v55 = vrot.slane %v623_v43, 1  ;;  %v289_v56 = vadd.f32 %v269_v40, %v227_v44  ;;  %v393_v57 = vmul.f32 %v2253_v41, %v2497_v15  ;;  %v2194_v41 = vld [vmem:[%s3766_s1 + $0xb8] sm:$0xff] }
  0x19   : > { %v353_v54 = vadd.f32 %v333_v26, %v291_v42  ;;  %v455_v61 = vmul.f32 %v2273_v46, %v2499_v16  ;;  %v517_v62 = vmul.f32 %v2293_v47, %v2501_v17  ;;  %v225_v63 = vadd.f32 %v205_v51, %v163_v50  ;;  %v2271_v1 = vld [vmem:[%s3766_s1 + $0x320] sm:$0xff]  ;;  %v2214_v42 = vld [vmem:[%s3766_s1 + $0x158] sm:$0xff]  ;;  %v2316_v46 = vld [vmem:[%s3766_s1 + $0x488] sm:$0xff] }
  0x1a   : > { %v329_v0 = vmul.f32 %v2231_v48, %v2492_v13  ;;  %v2581_v3 = vadd.f32 %v624_v55, %v623_v43  ;;  %v351_v4 = vadd.f32 %v331_v45, %v289_v56  ;;  %v391_v5 = vmul.f32 %v2251_v53, %v2497_v15  ;;  %v2291_v8 = vld [vmem:[%s3766_s1 + $0x3c0] sm:$0xff]  ;;  %v2234_v47 = vld [vmem:[%s3766_s1 + $0x1f8] sm:$0xff] }
  0x1b   : > { %v415_v2 = vadd.f32 %v395_v37, %v353_v54  ;;  %v287_v7 = vadd.f32 %v267_v52, %v225_v63  ;;  %v168_v12 = vmul.f32 %v2483_v9, %v147_v58  ;;  %v210_v14 = vmul.f32 %v2196_v59, %v2485_v10  ;;  %v2311_v23 = vld [vmem:[%s3766_s1 + $0x460] sm:$0xff]  ;;  %v2254_v53 = vld [vmem:[%s3766_s1 + $0x298] sm:$0xff] }
  0x1c   : > { %v272_v18 = vmul.f32 %v2216_v60, %v2487_v11  ;;  %2365 = vrcp.f32 %v2581_v3  ;;  %v635_v21 = vand.u32 2147483647, %v2581_v3  ;;  %v453_v22 = vmul.f32 %v2271_v1, %v2499_v16  ;;  %v2274_v59 = vld [vmem:[%s3766_s1 + $0x338] sm:$0xff]  ;;  %v143_v60 = vld [vmem:[%s3766_s1 + $0x8] sm:$0xff] }
  0x1d   : > { %v477_v20 = vadd.f32 %v457_v38, %v415_v2  ;;  %v637_v24 = vand.u32 2147483648, %v2581_v3  ;;  %v413_v25 = vadd.f32 %v393_v57, %v351_v4  ;;  %v349_v26 = vadd.f32 %v329_v0, %v287_v7  ;;  %v2192_v1 = vld [vmem:[%s3766_s1 + $0xa8] sm:$0xff]  ;;  %v2294_v7 = vld [vmem:[%s3766_s1 + $0x3d8] sm:$0xff] }
  0x1e   : > { %v230_v27 = vadd.f32 %v210_v14, %v168_v12  ;;  %v579_v31 = vmul.f32 %v2313_v6, %v2525_v28  ;;  %v515_v32 = vmul.f32 %v2291_v8, %v2501_v17  ;;  %v334_v33 = vmul.f32 %v2236_v19, %v2492_v13  ;;  %v2212_v2 = vld [vmem:[%s3766_s1 + $0x148] sm:$0xff]  ;;  %v2314_v8 = vld [vmem:[%s3766_s1 + $0x478] sm:$0xff] }
  0x1f   : > { %v539_v30 = vadd.f32 %v519_v39, %v477_v20  ;;  %v475_v36 = vadd.f32 %v455_v61, %v413_v25  ;;  %v411_v37 = vadd.f32 %v391_v5, %v349_v26  ;;  %v577_v38 = vmul.f32 %v2311_v23, %v2525_v28  ;;  %v2296_v39 = vld [vmem:[%s3766_s1 + $0x3e8] sm:$0xff]  ;;  %v150_v26 = vld [vmem:[%s3766_s1 + $0x40] sm:$0xff] }
  0x20   : > { %v292_v40 = vadd.f32 %v272_v18, %v230_v27  ;;  %vm631_vm1 = vweird.f32 %v2581_v3  ;;  %v2628_v44 = vor.u32 1.1754944e-38, %v637_v24  ;;  %v396_v45 = vmul.f32 %v2256_v29, %v2497_v15  ;;  %v2232_v20 = vld [vmem:[%s3766_s1 + $0x1e8] sm:$0xff]  ;;  %v2199_v27 = vld [vmem:[%s3766_s1 + $0xe0] sm:$0xff] }
  0x21   : > { %v2625_v43 = vadd.f32 %v581_v49, %v539_v30  ;;  %vm2637_vm2 = vcmp.eq.f32.partialorder %v635_v21, 8.507059e+37  ;;  %v537_v49 = vadd.f32 %v517_v62, %v475_v36  ;;  %v473_v50 = vadd.f32 %v453_v22, %v411_v37  ;;  %v2252_v21 = vld [vmem:[%s3766_s1 + $0x288] sm:$0xff] }
  0x22   : > { %v354_v51 = vadd.f32 %v334_v33, %v292_v40  ;;  %v166_v52 = vmul.f32 %v2483_v9, %v145_v35  ;;  %v2366_v54 = vpop.eup %2365  ;;  %v458_v55 = vmul.f32 %v2276_v34, %v2499_v16  ;;  %v520_v56 = vmul.f32 %v2296_v39, %v2501_v17  ;;  %v2272_v33 = vld [vmem:[%s3766_s1 + $0x328] sm:$0xff]  ;;  %v2219_v34 = vld [vmem:[%s3766_s1 + $0x180] sm:$0xff] }
  0x23   : > { %v208_v57 = vmul.f32 %v2194_v41, %v2485_v10  ;;  %v270_v58 = vmul.f32 %v2214_v42, %v2487_v11  ;;  %v627_v61 = vmul.f32 %v2366_v54, %v2581_v3  ;;  %v535_v62 = vadd.f32 %v515_v32, %v473_v50  ;;  %v2292_v39 = vld [vmem:[%s3766_s1 + $0x3c8] sm:$0xff] }
  0x24   : > { %v582_v63 = vmul.f32 %v2316_v46, %v2525_v28  ;;  %v332_v0 = vmul.f32 %v2234_v47, %v2492_v13  ;;  %vm632_vm3 = vweird.f32 %v2366_v54  ;;  %v416_v4 = vadd.f32 %v396_v45, %v354_v51  ;;  %v2312_v41 = vld [vmem:[%s3766_s1 + $0x468] sm:$0xff]  ;;  %v2239_v47 = vld [vmem:[%s3766_s1 + $0x220] sm:$0xff] }
  0x25   : > { %v228_v5 = vadd.f32 %v208_v57, %v166_v52  ;;  %v394_v6 = vmul.f32 %v2254_v53, %v2497_v15  ;;  %v628_v12 = vsub.f32 1.0, %v627_v61  ;;  %v2671_v14 = vadd.f32 %v579_v31, %v537_v49  ;;  %vm2702_vm4 = vmor %vm631_vm1, %vm632_vm3 }
  0x26   : > { %v456_v18 = vmul.f32 %v2274_v59, %v2499_v16  ;;  %v164_v19 = vmul.f32 %v2483_v9, %v143_v60  ;;  %v478_v22 = vadd.f32 %v458_v55, %v416_v4  ;;  %v206_v24 = vmul.f32 %v2192_v1, %v2485_v10  ;;  %v2198_v1 = vld [vmem:[%s3766_s1 + $0xd8] sm:$0xff] }
  0x27   : > { %v290_v23 = vadd.f32 %v270_v58, %v228_v5  ;;  %v268_v25 = vmul.f32 %v2212_v2, %v2487_v11  ;;  %v629_v29 = vmul.f32 %v2366_v54, %v628_v12  ;;  %v2689_v30 = vadd.f32 %v577_v38, %v535_v62  ;;  %v2259_v58 = vld [vmem:[%s3766_s1 + $0x2c0] sm:$0xff]  ;;  %v2218_v5 = vld [vmem:[%s3766_s1 + $0x178] sm:$0xff] }
  0x28   : > { %v518_v31 = vmul.f32 %v2294_v7, %v2501_v17  ;;  %v580_v32 = vmul.f32 %v2314_v8, %v2525_v28  ;;  %v226_v37 = vadd.f32 %v206_v24, %v164_v19  ;;  %v330_v38 = vmul.f32 %v2232_v20, %v2492_v13  ;;  %v2238_v19 = vld [vmem:[%s3766_s1 + $0x218] sm:$0xff]  ;;  %v2319_v20 = vld [vmem:[%s3766_s1 + $0x4a0] sm:$0xff] }
  0x29   : > { %v352_v36 = vadd.f32 %v332_v0, %v290_v23  ;;  %v392_v40 = vmul.f32 %v2252_v21, %v2497_v15  ;;  %v630_v42 = vadd.f32 %v2366_v54, %v629_v29  ;;  %v540_v3 = vadd.f32 %v520_v56, %v478_v22  ;;  %v149_v0 = vld [vmem:[%s3766_s1 + $0x38] sm:$0xff]  ;;  %v148_v29 = vld [vmem:[%s3766_s1 + $0x30] sm:$0xff] }
  0x2a   : > { %v171_v45 = vmul.f32 %v2483_v9, %v150_v26  ;;  %v213_v46 = vmul.f32 %v2199_v27, %v2485_v10  ;;  %v288_v50 = vadd.f32 %v268_v25, %v226_v37  ;;  %v454_v51 = vmul.f32 %v2272_v33, %v2499_v16  ;;  %v2258_v23 = vld [vmem:[%s3766_s1 + $0x2b8] sm:$0xff]  ;;  %v2217_v37 = vld [vmem:[%s3766_s1 + $0x170] sm:$0xff] }
  0x2b   : > { %v414_v49 = vadd.f32 %v394_v6, %v352_v36  ;;  %v275_v52 = vmul.f32 %v2219_v34, %v2487_v11  ;;  %v634_v53 = vsel %vm2702_vm4, %v2366_v54, %v630_v42  ;;  %v516_v55 = vmul.f32 %v2292_v39, %v2501_v17  ;;  %v2279_v54 = vld [vmem:[%s3766_s1 + $0x360] sm:$0xff]  ;;  %v2278_v36 = vld [vmem:[%s3766_s1 + $0x358] sm:$0xff] }
  0x2c   : > { %v578_v56 = vmul.f32 %v2312_v41, %v2525_v28  ;;  %v233_v57 = vadd.f32 %v213_v46, %v171_v45  ;;  %v2731_v59 = vsel %vm2637_vm2, %v2628_v44, %v634_v53  ;;  %v350_v61 = vadd.f32 %v330_v38, %v288_v50  ;;  %v2298_v42 = vld [vmem:[%s3766_s1 + $0x3f8] sm:$0xff] }
  0x2d   : > { %v476_v60 = vadd.f32 %v456_v18, %v414_v49  ;;  %v337_v62 = vmul.f32 %v2239_v47, %v2492_v13  ;;  %v645_v44 = vmul.f32 %v2731_v59, %v2625_v43  ;;  %v643_v48 = vmul.f32 %v2731_v59, %v2671_v14  ;;  %v2299_v18 = vld [vmem:[%s3766_s1 + $0x400] sm:$0xff]  ;;  %v2318_v47 = vld [vmem:[%s3766_s1 + $0x498] sm:$0xff] }
  0x2e   : > { %v641_v2 = vmul.f32 %v2731_v59, %v2689_v30  ;;  %v2749_v4 = vadd.f32 %v582_v63, %v540_v3  ;;  %v412_v7 = vadd.f32 %v392_v40, %v350_v61  ;;  %v295_v8 = vadd.f32 %v275_v52, %v233_v57  ;;  %v2237_v3 = vld [vmem:[%s3766_s1 + $0x210] sm:$0xff] }
  0x2f   : > { %v538_v6 = vadd.f32 %v518_v31, %v476_v60  ;;  %v399_v12 = vmul.f32 %v2259_v58, %v2497_v15  ;;  %669 = vadd.xlane.f32.xlu2 %v645_v44  ;;  %665 = vadd.xlane.f32.xlu1 %v643_v48  ;;  %v461_v63 = vmul.f32 %v2279_v54, %v2499_v16  ;;  %v2197_v31 = vld [vmem:[%s3766_s1 + $0xd0] sm:$0xff]  ;;  %v153_v58 = vld [vmem:[%s3766_s1 + $0x58] sm:$0xff] }
  0x30   : > { %v170_v21 = vmul.f32 %v2483_v9, %v149_v0  ;;  %v212_v22 = vmul.f32 %v2198_v1, %v2485_v10  ;;  %661 = vadd.xlane.f32.xlu0 %v641_v2  ;;  %v474_v25 = vadd.f32 %v454_v51, %v412_v7  ;;  %v357_v26 = vadd.f32 %v337_v62, %v295_v8  ;;  %v2257_v51 = vld [vmem:[%s3766_s1 + $0x2b0] sm:$0xff]  ;;  %v2202_v0 = vld [vmem:[%s3766_s1 + $0xf8] sm:$0xff] }
  0x31   : > { %v2770_v24 = vadd.f32 %v580_v32, %v538_v6  ;;  %v274_v27 = vmul.f32 %v2218_v5, %v2487_v11  ;;  %v646_v33 = vmul.f32 %v2731_v59, %v2749_v4  ;;  %v523_v34 = vmul.f32 %v2299_v18, %v2501_v17  ;;  %v2222_v1 = vld [vmem:[%s3766_s1 + $0x198] sm:$0xff]  ;;  %v2297_v6 = vld [vmem:[%s3766_s1 + $0x3f0] sm:$0xff] }
  0x32   : > { %v232_v35 = vadd.f32 %v212_v22, %v170_v21  ;;  %v336_v32 = vmul.f32 %v2238_v19, %v2492_v13  ;;  %v536_v38 = vadd.f32 %v516_v55, %v474_v25  ;;  %v419_v40 = vadd.f32 %v399_v12, %v357_v26  ;;  %v2317_v7 = vld [vmem:[%s3766_s1 + $0x490] sm:$0xff]  ;;  %v2242_v19 = vld [vmem:[%s3766_s1 + $0x238] sm:$0xff] }
  0x33   : > { %v585_v39 = vmul.f32 %v2319_v20, %v2525_v28  ;;  %v398_v41 = vmul.f32 %v2258_v23, %v2497_v15  ;;  %v644_v45 = vmul.f32 %v2731_v59, %v2770_v24  ;;  %v169_v49 = vmul.f32 %v2483_v9, %v148_v29  ;;  %v152_v25 = vld [vmem:[%s3766_s1 + $0x50] sm:$0xff] }
  0x34   : > { %v294_v46 = vadd.f32 %v274_v27, %v232_v35  ;;  %v211_v50 = vmul.f32 %v2197_v31, %v2485_v10  ;;  %v2807_v52 = vadd.f32 %v578_v56, %v536_v38  ;;  %v481_v53 = vadd.f32 %v461_v63, %v419_v40  ;;  %v2277_v56 = vld [vmem:[%s3766_s1 + $0x350] sm:$0xff]  ;;  %v2262_v63 = vld [vmem:[%s3766_s1 + $0x2d8] sm:$0xff] }
  0x35   : > { %v460_v55 = vmul.f32 %v2278_v36, %v2499_v16  ;;  %v273_v57 = vmul.f32 %v2217_v37, %v2487_v11  ;;  %v522_v61 = vmul.f32 %v2298_v42, %v2501_v17  ;;  %v335_v54 = vmul.f32 %v2237_v3, %v2492_v13  ;;  %v2201_v26 = vld [vmem:[%s3766_s1 + $0xf0] sm:$0xff]  ;;  %v2302_v35 = vld [vmem:[%s3766_s1 + $0x418] sm:$0xff] }
  0x36   : > { %v356_v60 = vadd.f32 %v336_v32, %v294_v46  ;;  %v231_v62 = vadd.f32 %v211_v50, %v169_v49  ;;  %v642_v44 = vmul.f32 %v2731_v59, %v2807_v52  ;;  %v543_v48 = vadd.f32 %v523_v34, %v481_v53  ;;  %v2282_v34 = vld [vmem:[%s3766_s1 + $0x378] sm:$0xff]  ;;  %v2221_v32 = vld [vmem:[%s3766_s1 + $0x190] sm:$0xff]  ;;  %v151_v49 = vld [vmem:[%s3766_s1 + $0x48] sm:$0xff] }
  0x37   : > { %v584_v2 = vmul.f32 %v2318_v47, %v2525_v28  ;;  %v397_v5 = vmul.f32 %v2257_v51, %v2497_v15  ;;  %671 = vadd.xlane.f32.xlu2 %v646_v33  ;;  %667 = vadd.xlane.f32.xlu1 %v644_v45  ;;  %v174_v18 = vmul.f32 %v2483_v9, %v153_v58  ;;  %v2322_v3 = vld [vmem:[%s3766_s1 + $0x4b8] sm:$0xff]  ;;  %v2261_v47 = vld [vmem:[%s3766_s1 + $0x2d0] sm:$0xff] }
  0x38   : > { %v418_v8 = vadd.f32 %v398_v41, %v356_v60  ;;  %v293_v12 = vadd.f32 %v273_v57, %v231_v62  ;;  %663 = vadd.xlane.f32.xlu0 %v642_v44  ;;  %v2842_v20 = vadd.f32 %v585_v39, %v543_v48  ;;  %v459_v21 = vmul.f32 %v2277_v56, %v2499_v16  ;;  %v2241_v39 = vld [vmem:[%s3766_s1 + $0x230] sm:$0xff]  ;;  %v2200_v57 = vld [vmem:[%s3766_s1 + $0xe8] sm:$0xff] }
  0x39   : > { %v216_v22 = vmul.f32 %v2202_v0, %v2485_v10  ;;  %v278_v23 = vmul.f32 %v2222_v1, %v2487_v11  ;;  %v521_v31 = vmul.f32 %v2297_v6, %v2501_v17  ;;  %v583_v33 = vmul.f32 %v2317_v7, %v2525_v28  ;;  %v2301_v56 = vld [vmem:[%s3766_s1 + $0x410] sm:$0xff]  ;;  %v2220_v0 = vld [vmem:[%s3766_s1 + $0x188] sm:$0xff] }
  0x3a   : > { %v480_v27 = vadd.f32 %v460_v55, %v418_v8  ;;  %v355_v29 = vadd.f32 %v335_v54, %v293_v12  ;;  %v649_v36 = vmul.f32 %v2731_v59, %v2842_v20  ;;  %v340_v38 = vmul.f32 %v2242_v19, %v2492_v13  ;;  %v2281_v54 = vld [vmem:[%s3766_s1 + $0x370] sm:$0xff]  ;;  %v2260_v19 = vld [vmem:[%s3766_s1 + $0x2c8] sm:$0xff] }
  0x3b   : > { %v236_v37 = vadd.f32 %v216_v22, %v174_v18  ;;  %v402_v40 = vmul.f32 %v2262_v63, %v2497_v15  ;;  %v173_v45 = vmul.f32 %v2483_v9, %v152_v25  ;;  %v215_v46 = vmul.f32 %v2201_v26, %v2485_v10  ;;  %v2321_v12 = vld [vmem:[%s3766_s1 + $0x4b0] sm:$0xff] }
  0x3c   : > { %v542_v41 = vadd.f32 %v522_v61, %v480_v27  ;;  %v417_v42 = vadd.f32 %v397_v5, %v355_v29  ;;  %v464_v51 = vmul.f32 %v2282_v34, %v2499_v16  ;;  %v526_v53 = vmul.f32 %v2302_v35, %v2501_v17  ;;  %v2240_v5 = vld [vmem:[%s3766_s1 + $0x228] sm:$0xff]  ;;  %v156_v63 = vld [vmem:[%s3766_s1 + $0x70] sm:$0xff] }
  0x3d   : > { %v298_v50 = vadd.f32 %v278_v23, %v236_v37  ;;  %v277_v55 = vmul.f32 %v2221_v32, %v2487_v11  ;;  %v235_v61 = vadd.f32 %v215_v46, %v173_v45  ;;  %v339_v62 = vmul.f32 %v2241_v39, %v2492_v13  ;;  %v2205_v26 = vld [vmem:[%s3766_s1 + $0x110] sm:$0xff]  ;;  %v2280_v35 = vld [vmem:[%s3766_s1 + $0x368] sm:$0xff] }
  0x3e   : > { %v2888_v58 = vadd.f32 %v584_v2, %v542_v41  ;;  %v479_v60 = vadd.f32 %v459_v21, %v417_v42  ;;  %v588_v44 = vmul.f32 %v2322_v3, %v2525_v28  ;;  %v401_v48 = vmul.f32 %v2261_v47, %v2497_v15  ;;  %v2300_v32 = vld [vmem:[%s3766_s1 + $0x408] sm:$0xff]  ;;  %v2245_v39 = vld [vmem:[%s3766_s1 + $0x250] sm:$0xff] }
  0x3f   : > { %v360_v1 = vadd.f32 %v340_v38, %v298_v50  ;;  %v172_v2 = vmul.f32 %v2483_v9, %v151_v49  ;;  %677 = vadd.xlane.f32.xlu2 %v649_v36  ;;  %v297_v8 = vadd.f32 %v277_v55, %v235_v61  ;;  %v214_v18 = vmul.f32 %v2200_v57, %v2485_v10  ;;  %v2225_v36 = vld [vmem:[%s3766_s1 + $0x1b0] sm:$0xff]  ;;  %v2320_v45 = vld [vmem:[%s3766_s1 + $0x4a8] sm:$0xff] }
  0x40   : > { %v648_v6 = vmul.f32 %v2731_v59, %v2888_v58  ;;  %v541_v7 = vadd.f32 %v521_v31, %v479_v60  ;;  %v463_v22 = vmul.f32 %v2281_v54, %v2499_v16  ;;  %v525_v23 = vmul.f32 %v2301_v56, %v2501_v17  ;;  %v2265_v47 = vld [vmem:[%s3766_s1 + $0x2f0] sm:$0xff]  ;;  %v155_v49 = vld [vmem:[%s3766_s1 + $0x68] sm:$0xff] }
  0x41   : > { %v422_v21 = vadd.f32 %v402_v40, %v360_v1  ;;  %v276_v25 = vmul.f32 %v2220_v0, %v2487_v11  ;;  %v359_v29 = vadd.f32 %v339_v62, %v297_v8  ;;  %v234_v31 = vadd.f32 %v214_v18, %v172_v2  ;;  %v2204_v60 = vld [vmem:[%s3766_s1 + $0x108] sm:$0xff] }
  0x42   : > { %675 = vadd.xlane.f32.xlu1 %v648_v6  ;;  %v2924_v27 = vadd.f32 %v583_v33, %v541_v7  ;;  %v338_v34 = vmul.f32 %v2240_v5, %v2492_v13  ;;  %v587_v33 = vmul.f32 %v2321_v12, %v2525_v28  ;;  %v400_v38 = vmul.f32 %v2260_v19, %v2497_v15  ;;  %v2224_v0 = vld [vmem:[%s3766_s1 + $0x1a8] sm:$0xff]  ;;  %v2305_v19 = vld [vmem:[%s3766_s1 + $0x430] sm:$0xff] }
  0x43   : > { %v484_v37 = vadd.f32 %v464_v51, %v422_v21  ;;  %v177_v40 = vmul.f32 %v2483_v9, %v156_v63  ;;  %v421_v42 = vadd.f32 %v401_v48, %v359_v29  ;;  %v296_v3 = vadd.f32 %v276_v25, %v234_v31  ;;  %v2244_v1 = vld [vmem:[%s3766_s1 + $0x248] sm:$0xff]  ;;  %v154_v21 = vld [vmem:[%s3766_s1 + $0x60] sm:$0xff] }
  0x44   : > { %v647_v41 = vmul.f32 %v2731_v59, %v2924_v27  ;;  %v219_v46 = vmul.f32 %v2205_v26, %v2485_v10  ;;  %v462_v51 = vmul.f32 %v2280_v35, %v2499_v16  ;;  %v524_v55 = vmul.f32 %v2300_v32, %v2501_v17  ;;  %v2264_v7 = vld [vmem:[%s3766_s1 + $0x2e8] sm:$0xff] }
  0x45   : > { %v546_v50 = vadd.f32 %v526_v53, %v484_v37  ;;  %v281_v57 = vmul.f32 %v2225_v36, %v2487_v11  ;;  %v483_v61 = vadd.f32 %v463_v22, %v421_v42  ;;  %v358_v62 = vadd.f32 %v338_v34, %v296_v3  ;;  %v2285_v53 = vld [vmem:[%s3766_s1 + $0x390] sm:$0xff]  ;;  %v2284_v29 = vld [vmem:[%s3766_s1 + $0x388] sm:$0xff]  ;;  %v2203_v37 = vld [vmem:[%s3766_s1 + $0x100] sm:$0xff] }
  0x46   : > { %673 = vadd.xlane.f32.xlu0 %v647_v41  ;;  %v239_v54 = vadd.f32 %v219_v46, %v177_v40  ;;  %v343_v56 = vmul.f32 %v2245_v39, %v2492_v13  ;;  %v586_v2 = vmul.f32 %v2320_v45, %v2525_v28  ;;  %v405_v5 = vmul.f32 %v2265_v47, %v2497_v15  ;;  %v2304_v36 = vld [vmem:[%s3766_s1 + $0x428] sm:$0xff] }
  0x47   : > { %v2970_v48 = vadd.f32 %v588_v44, %v546_v50  ;;  %v176_v6 = vmul.f32 %v2483_v9, %v155_v49  ;;  %v545_v8 = vadd.f32 %v525_v23, %v483_v61  ;;  %v420_v12 = vadd.f32 %v400_v38, %v358_v62  ;;  %v2325_v44 = vld [vmem:[%s3766_s1 + $0x4d0] sm:$0xff]  ;;  %v2223_v38 = vld [vmem:[%s3766_s1 + $0x1a0] sm:$0xff]  ;;  %v2324_v41 = vld [vmem:[%s3766_s1 + $0x4c8] sm:$0xff] }
  0x48   : > { %v301_v18 = vadd.f32 %v281_v57, %v239_v54  ;;  %v218_v63 = vmul.f32 %v2204_v60, %v2485_v10  ;;  %v467_v23 = vmul.f32 %v2285_v53, %v2499_v16  ;;  %v280_v25 = vmul.f32 %v2224_v0, %v2487_v11  ;;  %v2243_v49 = vld [vmem:[%s3766_s1 + $0x240] sm:$0xff]  ;;  %v2208_v62 = vld [vmem:[%s3766_s1 + $0x128] sm:$0xff] }
  0x49   : > { %v652_v22 = vmul.f32 %v2731_v59, %v2970_v48  ;;  %v342_v26 = vmul.f32 %v2244_v1, %v2492_v13  ;;  %v2996_v31 = vadd.f32 %v587_v33, %v545_v8  ;;  %v482_v34 = vadd.f32 %v462_v51, %v420_v12  ;;  %v2263_v50 = vld [vmem:[%s3766_s1 + $0x2e0] sm:$0xff]  ;;  %v159_v51 = vld [vmem:[%s3766_s1 + $0x88] sm:$0xff] }
  0x4a   : > { %v363_v35 = vadd.f32 %v343_v56, %v301_v18  ;;  %v238_v32 = vadd.f32 %v218_v63, %v176_v6  ;;  %v529_v40 = vmul.f32 %v2305_v19, %v2501_v17  ;;  %v591_v33 = vmul.f32 %v2325_v44, %v2525_v28  ;;  %v2283_v1 = vld [vmem:[%s3766_s1 + $0x380] sm:$0xff]  ;;  %v2228_v6 = vld [vmem:[%s3766_s1 + $0x1c8] sm:$0xff] }
  0x4b   : > { %683 = vadd.xlane.f32.xlu2 %v652_v22  ;;  %v404_v39 = vmul.f32 %v2264_v7, %v2497_v15  ;;  %v175_v42 = vmul.f32 %v2483_v9, %v154_v21  ;;  %v651_v3 = vmul.f32 %v2731_v59, %v2996_v31  ;;  %v544_v45 = vadd.f32 %v524_v55, %v482_v34  ;;  %v2248_v18 = vld [vmem:[%s3766_s1 + $0x268] sm:$0xff]  ;;  %v2323_v21 = vld [vmem:[%s3766_s1 + $0x4c0] sm:$0xff] }
  0x4c   : > { %v425_v46 = vadd.f32 %v405_v5, %v363_v35  ;;  %v300_v47 = vadd.f32 %v280_v25, %v238_v32  ;;  %v466_v57 = vmul.f32 %v2284_v29, %v2499_v16  ;;  %v528_v60 = vmul.f32 %v2304_v36, %v2501_v17  ;;  %v2303_v5 = vld [vmem:[%s3766_s1 + $0x420] sm:$0xff] }
  0x4d   : > { %v217_v55 = vmul.f32 %v2203_v37, %v2485_v10  ;;  %v279_v61 = vmul.f32 %v2223_v38, %v2487_v11  ;;  %681 = vadd.xlane.f32.xlu1 %v651_v3  ;;  %v3032_v54 = vadd.f32 %v586_v2, %v544_v45  ;;  %v590_v0 = vmul.f32 %v2324_v41, %v2525_v28  ;;  %v158_v25 = vld [vmem:[%s3766_s1 + $0x80] sm:$0xff]  ;;  %v2308_v41 = vld [vmem:[%s3766_s1 + $0x448] sm:$0xff] }
  0x4e   : > { %v487_v56 = vadd.f32 %v467_v23, %v425_v46  ;;  %v362_v53 = vadd.f32 %v342_v26, %v300_v47  ;;  %v341_v2 = vmul.f32 %v2243_v49, %v2492_v13  ;;  %v403_v8 = vmul.f32 %v2263_v50, %v2497_v15  ;;  %v2268_v23 = vld [vmem:[%s3766_s1 + $0x308] sm:$0xff]  ;;  %v2207_v32 = vld [vmem:[%s3766_s1 + $0x120] sm:$0xff] }
  0x4f   : > { %v237_v7 = vadd.f32 %v217_v55, %v175_v42  ;;  %v180_v12 = vmul.f32 %v2483_v9, %v159_v51  ;;  %v650_v19 = vmul.f32 %v2731_v59, %v3032_v54  ;;  %v222_v22 = vmul.f32 %v2208_v62, %v2485_v10  ;;  %v2227_v42 = vld [vmem:[%s3766_s1 + $0x1c0] sm:$0xff]  ;;  %v157_v62 = vld [vmem:[%s3766_s1 + $0x78] sm:$0xff] }
  0x50   : > { %v549_v44 = vadd.f32 %v529_v40, %v487_v56  ;;  %v424_v63 = vadd.f32 %v404_v39, %v362_v53  ;;  %v465_v29 = vmul.f32 %v2283_v1, %v2499_v16  ;;  %v527_v34 = vmul.f32 %v2303_v5, %v2501_v17  ;;  %v2288_v39 = vld [vmem:[%s3766_s1 + $0x3a8] sm:$0xff]  ;;  %v2247_v47 = vld [vmem:[%s3766_s1 + $0x260] sm:$0xff]  ;;  %v2206_v5 = vld [vmem:[%s3766_s1 + $0x118] sm:$0xff] }
  0x51   : > { %v299_v26 = vadd.f32 %v279_v61, %v237_v7  ;;  %v284_v35 = vmul.f32 %v2228_v6, %v2487_v11  ;;  %679 = vadd.xlane.f32.xlu0 %v650_v19  ;;  %v242_v38 = vadd.f32 %v222_v22, %v180_v12  ;;  %v346_v40 = vmul.f32 %v2248_v18, %v2492_v13  ;;  %v2267_v61 = vld [vmem:[%s3766_s1 + $0x300] sm:$0xff]  ;;  %v2226_v19 = vld [vmem:[%s3766_s1 + $0x1b8] sm:$0xff] }
  0x52   : > { %v3068_v36 = vadd.f32 %v591_v33, %v549_v44  ;;  %v486_v37 = vadd.f32 %v466_v57, %v424_v63  ;;  %v589_v33 = vmul.f32 %v2323_v21, %v2525_v28  ;;  %v408_v45 = vmul.f32 %v2268_v23, %v2497_v15  ;;  %v2328_v57 = vld [vmem:[%s3766_s1 + $0x4e8] sm:$0xff]  ;;  %v2307_v18 = vld [vmem:[%s3766_s1 + $0x440] sm:$0xff]  ;;  %v2246_v22 = vld [vmem:[%s3766_s1 + $0x258] sm:$0xff] }
  0x53   : > { %v361_v3 = vadd.f32 %v341_v2, %v299_v26  ;;  %v179_v46 = vmul.f32 %v2483_v9, %v158_v25  ;;  %v304_v51 = vadd.f32 %v284_v35, %v242_v38  ;;  %v221_v55 = vmul.f32 %v2207_v32, %v2485_v10  ;;  %v2327_v35 = vld [vmem:[%s3766_s1 + $0x4e0] sm:$0xff]  ;;  %v2266_v32 = vld [vmem:[%s3766_s1 + $0x2f8] sm:$0xff] }
  0x54   : > { %v655_v49 = vmul.f32 %v2731_v59, %v3068_v36  ;;  %v548_v50 = vadd.f32 %v528_v60, %v486_v37  ;;  %v470_v53 = vmul.f32 %v2288_v39, %v2499_v16  ;;  %v532_v60 = vmul.f32 %v2308_v41, %v2501_v17  ;;  %v161_v37 = vld [vmem:[%s3766_s1 + $0x98] sm:$0xff] }
  0x55   : > { %v423_v56 = vadd.f32 %v403_v8, %v361_v3  ;;  %v283_v1 = vmul.f32 %v2227_v42, %v2487_v11  ;;  %v366_v7 = vadd.f32 %v346_v40, %v304_v51  ;;  %v241_v2 = vadd.f32 %v221_v55, %v179_v46  ;;  %v2287_v8 = vld [vmem:[%s3766_s1 + $0x3a0] sm:$0xff]  ;;  %v2210_v42 = vld [vmem:[%s3766_s1 + $0x138] sm:$0xff] }
  0x56   : > { %689 = vadd.xlane.f32.xlu2 %v655_v49  ;;  %v3104_v6 = vadd.f32 %v590_v0, %v548_v50  ;;  %v345_v12 = vmul.f32 %v2247_v47, %v2492_v13  ;;  %v594_v0 = vmul.f32 %v2328_v57, %v2525_v28  ;;  %v407_v63 = vmul.f32 %v2267_v61, %v2497_v15  ;;  %v2230_v49 = vld [vmem:[%s3766_s1 + $0x1d8] sm:$0xff] }
  0x57   : > { %v485_v44 = vadd.f32 %v465_v29, %v423_v56  ;;  %v178_v21 = vmul.f32 %v2483_v9, %v157_v62  ;;  %v428_v25 = vadd.f32 %v408_v45, %v366_v7  ;;  %v303_v26 = vadd.f32 %v283_v1, %v241_v2  ;;  %v2250_v50 = vld [vmem:[%s3766_s1 + $0x278] sm:$0xff]  ;;  %v160_v7 = vld [vmem:[%s3766_s1 + $0x90] sm:$0xff] }
  0x58   : > { %v654_v23 = vmul.f32 %v2731_v59, %v3104_v6  ;;  %v220_v29 = vmul.f32 %v2206_v5, %v2485_v10  ;;  %v469_v40 = vmul.f32 %v2287_v8, %v2499_v16  ;;  %v531_v39 = vmul.f32 %v2307_v18, %v2501_v17  ;;  %v2306_v1 = vld [vmem:[%s3766_s1 + $0x438] sm:$0xff] }
  0x59   : > { %v547_v38 = vadd.f32 %v527_v34, %v485_v44  ;;  %v282_v41 = vmul.f32 %v2226_v19, %v2487_v11  ;;  %v490_v3 = vadd.f32 %v470_v53, %v428_v25  ;;  %v365_v45 = vadd.f32 %v345_v12, %v303_v26  ;;  %v2286_v34 = vld [vmem:[%s3766_s1 + $0x398] sm:$0xff] }
  0x5a   : > { %687 = vadd.xlane.f32.xlu1 %v654_v23  ;;  %v240_v46 = vadd.f32 %v220_v29, %v178_v21  ;;  %v344_v47 = vmul.f32 %v2246_v22, %v2492_v13  ;;  %v593_v57 = vmul.f32 %v2327_v35, %v2525_v28  ;;  %v406_v55 = vmul.f32 %v2266_v32, %v2497_v15  ;;  %v2209_v22 = vld [vmem:[%s3766_s1 + $0x130] sm:$0xff]  ;;  %v2290_v26 = vld [vmem:[%s3766_s1 + $0x3b8] sm:$0xff] }
  0x5b   : > { %v3150_v51 = vadd.f32 %v589_v33, %v547_v38  ;;  %v182_v61 = vmul.f32 %v2483_v9, %v161_v37  ;;  %v552_v62 = vadd.f32 %v532_v60, %v490_v3  ;;  %v427_v56 = vadd.f32 %v407_v63, %v365_v45  ;;  %v2270_v33 = vld [vmem:[%s3766_s1 + $0x318] sm:$0xff]  ;;  %v2229_v23 = vld [vmem:[%s3766_s1 + $0x1d0] sm:$0xff] }
  0x5c   : > { %v302_v53 = vadd.f32 %v282_v41, %v240_v46  ;;  %v224_v5 = vmul.f32 %v2210_v42, %v2485_v10  ;;  %v468_v60 = vmul.f32 %v2286_v34, %v2499_v16  ;;  %v286_v12 = vmul.f32 %v2230_v49, %v2487_v11  ;;  %v2326_v63 = vld [vmem:[%s3766_s1 + $0x4d8] sm:$0xff]  ;;  %v2269_v34 = vld [vmem:[%s3766_s1 + $0x310] sm:$0xff] }
  0x5d   : > { %v653_v2 = vmul.f32 %v2731_v59, %v3150_v51  ;;  %v348_v8 = vmul.f32 %v2250_v50, %v2492_v13  ;;  %v3170_v18 = vadd.f32 %v594_v0, %v552_v62  ;;  %v489_v19 = vadd.f32 %v469_v40, %v427_v56  ;;  %v2249_v40 = vld [vmem:[%s3766_s1 + $0x270] sm:$0xff]  ;;  %v2310_v42 = vld [vmem:[%s3766_s1 + $0x458] sm:$0xff] }
  0x5e   : > { %v364_v44 = vadd.f32 %v344_v47, %v302_v53  ;;  %v244_v21 = vadd.f32 %v224_v5, %v182_v61  ;;  %v530_v25 = vmul.f32 %v2306_v1, %v2501_v17  ;;  %v410_v0 = vmul.f32 %v2270_v33, %v2497_v15  ;;  %v2330_v49 = vld [vmem:[%s3766_s1 + $0x4f8] sm:$0xff]  ;;  %v2289_v62 = vld [vmem:[%s3766_s1 + $0x3b0] sm:$0xff] }
  0x5f   : > { %3781 = vst [vmem:[#allocation2_spill] sm:$0xff] %v3170_v18  ;;  %685 = vadd.xlane.f32.xlu0 %v653_v2  ;;  %v181_v35 = vmul.f32 %v2483_v9, %v160_v7  ;;  %v658_v29 = vmul.f32 %v2731_v59, %v3170_v18  ;;  %v551_v32 = vadd.f32 %v531_v39, %v489_v19  ;;  %v2309_v33 = vld [vmem:[%s3766_s1 + $0x450] sm:$0xff] }
  0x60   : > { %v426_v37 = vadd.f32 %v406_v55, %v364_v44  ;;  %v306_v38 = vadd.f32 %v286_v12, %v244_v21  ;;  %v592_v41 = vmul.f32 %v2326_v63, %v2525_v28  ;;  %v223_v3 = vmul.f32 %v2209_v22, %v2485_v10 }
  0x61   : > { %v285_v9 = vmul.f32 %v2229_v23, %v2487_v11  ;;  %695 = vadd.xlane.f32.xlu2 %v658_v29  ;;  %v3198_v45 = vadd.f32 %v593_v57, %v551_v32  ;;  %v472_v47 = vmul.f32 %v2290_v26, %v2499_v16  ;;  %v347_v10 = vmul.f32 %v2249_v40, %v2492_v13 }
  0x62   : > { %v488_v39 = vadd.f32 %v468_v60, %v426_v37  ;;  %v368_v46 = vadd.f32 %v348_v8, %v306_v38  ;;  %v243_v50 = vadd.f32 %v223_v3, %v181_v35  ;;  %v534_v61 = vmul.f32 %v2310_v42, %v2501_v17 }
  0x63   : > { %3782 = vst [vmem:[#allocation3_spill] sm:$0xff] %v3198_v45  ;;  %v657_v11 = vmul.f32 %v2731_v59, %v3198_v45  ;;  %v409_v53 = vmul.f32 %v2269_v34, %v2497_v15  ;;  %v596_v13 = vmul.f32 %v2330_v49, %v2525_v28  ;;  %v471_v2 = vmul.f32 %v2289_v62, %v2499_v16  ;;  %v2329_v15 = vld [vmem:[%s3766_s1 + $0x4f0] sm:$0xff] }
  0x64   : > { %v550_v57 = vadd.f32 %v530_v25, %v488_v39  ;;  %v430_v55 = vadd.f32 %v410_v0, %v368_v46  ;;  %v305_v56 = vadd.f32 %v285_v9, %v243_v50  ;;  %v533_v19 = vmul.f32 %v2309_v33, %v2501_v17 }
  0x65   : > { %693 = vadd.xlane.f32.xlu1 %v657_v11  ;;  %v595_v21 = vmul.f32 %v2329_v15, %v2525_v28  ;;  %v741_v0 = vlaneseq }
  0x66   : > { %v3215_v1 = vadd.f32 %v592_v41, %v550_v57  ;;  %v492_v5 = vadd.f32 %v472_v47, %v430_v55  ;;  %v367_v7 = vadd.f32 %v347_v10, %v305_v56 }
  0x67   : > { %v3238_v29 = vand.u32 127, %v741_v0 }
  0x68   : > { %3783 = vst [vmem:[#allocation4_spill] sm:$0xff] %v3215_v1  ;;  %v656_v60 = vmul.f32 %v2731_v59, %v3215_v1  ;;  %v554_v12 = vadd.f32 %v534_v61, %v492_v5  ;;  %v429_v8 = vadd.f32 %v409_v53, %v367_v7 }
  0x69   : > { %3784 = vst [vmem:[#allocation5_spill] sm:$0xff] %v3238_v29  ;;  %v3241_v28 = vadd.s32 4294967288, %v3238_v29 }
  0x6a   : > { %691 = vadd.xlane.f32.xlu0 %v656_v60  ;;  %v3228_v44 = vadd.f32 %v596_v13, %v554_v12  ;;  %v491_v63 = vadd.f32 %v471_v2, %v429_v8 }
  0x6b   : > { %3785 = vst [vmem:[#allocation6_spill] sm:$0xff] %v3241_v28 }
  0x6c   : > { %v660_v16 = vmul.f32 %v2731_v59, %v3228_v44  ;;  %v553_v22 = vadd.f32 %v533_v19, %v491_v63 }
  0x6e   : > { %699 = vadd.xlane.f32.xlu1 %v660_v16  ;;  %v3233_v23 = vadd.f32 %v595_v21, %v553_v22 }
  0x70   : > { %v659_v25 = vmul.f32 %v2731_v59, %v3233_v23 }
  0x72   : > { %697 = vadd.xlane.f32.xlu0 %v659_v25 }
  0xa2   : > { %v670_v26 = vpop.xlane.xlu2 %669  ;;  %v666_v17 = vpop.xlane.xlu1 %665 }
  0xa3   : > { %v662_v35 = vpop.xlane.xlu0 %661  ;;  %v882_v32 = vperm.slane %v670_v26, %v3238_v29  ;;  %v879_v40 = vperm.slane %v666_v17, %v3238_v29  ;;  %v703_v63 = vmul.f32 %v666_v17, %v666_v17  ;;  %v705_v22 = vmul.f32 %v670_v26, %v670_v26 }
  0xa4   : > { %v876_v3 = vperm.slane %v662_v35, %v3238_v29  ;;  %v701_v25 = vmul.f32 %v662_v35, %v662_v35 }
  0xa5   : > { %v751_v26 = vperm.slane %v705_v22, %v3238_v29 }
  0xa6   : > { %v743_v35 = vperm.slane %v701_v25, %v3238_v29 }
  0xaa   : > { %v672_v37 = vpop.xlane.xlu2 %671  ;;  %v668_v38 = vpop.xlane.xlu1 %667 }
  0xab   : > { %v883_v59 = vperm.slane %v672_v37, %v3241_v28  ;;  %v880_v41 = vperm.slane %v668_v38, %v3241_v28  ;;  %v664_v42 = vpop.xlane.xlu0 %663  ;;  %v704_v19 = vmul.f32 %v668_v38, %v668_v38 }
  0xac   : > { %v877_v9 = vperm.slane %v664_v42, %v3241_v28  ;;  %v702_v21 = vmul.f32 %v664_v42, %v664_v42 }
  0xad   : > { %v884_v39 = vsel %vm746_vm5, %v883_v59, %v882_v32  ;;  %v881_v46 = vsel %vm746_vm5, %v880_v41, %v879_v40  ;;  %v706_v32 = vmul.f32 %v672_v37, %v672_v37  ;;  %v749_v40 = vperm.slane %v704_v19, %v3241_v28 }
  0xae   : > { %v878_v47 = vsel %vm746_vm5, %v877_v9, %v876_v3  ;;  %v748_v41 = vperm.slane %v703_v63, %v3238_v29  ;;  %v745_v3 = vperm.slane %v702_v21, %v3241_v28 }
  0xaf   : > { %v906_v34 = vsel %vm775_vm6, %v881_v46, %v878_v47  ;;  %v752_v37 = vperm.slane %v706_v32, %v3241_v28 }
  0xb0   : > { %v907_v49 = vsel %vm777_vm7, %v884_v39, %v906_v34  ;;  %v750_v38 = vsel %vm746_vm5, %v749_v40, %v748_v41 }
  0xb2   : > { %v678_v50 = vpop.xlane.xlu2 %677 }
  0xb3   : > { %v888_v33 = vperm.slane %v678_v50, %v3238_v29  ;;  %v709_v47 = vmul.f32 %v678_v50, %v678_v50 }
  0xb5   : > { %v676_v10 = vpop.xlane.xlu1 %675 }
  0xb6   : > { %v886_v11 = vperm.slane %v676_v10, %v3241_v28  ;;  %v708_v9 = vmul.f32 %v676_v10, %v676_v10  ;;  %v747_v10 = vsel %vm746_vm5, %v745_v3, %v743_v35 }
  0xb8   : > { %v755_v50 = vperm.slane %v708_v9, %v3241_v28 }
  0xb9   : > { %v674_v57 = vpop.xlane.xlu0 %673 }
  0xba   : > { %v885_v55 = vperm.slane %v674_v57, %v3238_v29  ;;  %v707_v39 = vmul.f32 %v674_v57, %v674_v57 }
  0xbc   : > { %v887_v61 = vsel %vm746_vm5, %v886_v11, %v885_v55  ;;  %v754_v57 = vperm.slane %v707_v39, %v3238_v29 }
  0xbd   : > { %v908_v62 = vsel %vm779_vm8, %v887_v61, %v907_v49 }
  0xbe   : > { %v684_v56 = vpop.xlane.xlu2 %683 }
  0xbf   : > { %v892_v53 = vperm.slane %v684_v56, %v3241_v28  ;;  %v712_v42 = vmul.f32 %v684_v56, %v684_v56  ;;  %v753_v56 = vsel %vm746_vm5, %v752_v37, %v751_v26 }
  0xc0   : > { %v682_v5 = vpop.xlane.xlu1 %681 }
  0xc1   : > { %v891_v13 = vperm.slane %v682_v5, %v3238_v29  ;;  %v711_v49 = vmul.f32 %v682_v5, %v682_v5  ;;  %v776_v5 = vsel %vm775_vm6, %v750_v38, %v747_v10 }
  0xc3   : > { %v893_v7 = vsel %vm746_vm5, %v892_v53, %v891_v13 }
  0xc4   : > { %v680_v2 = vpop.xlane.xlu0 %679 }
  0xc5   : > { %v889_v60 = vperm.slane %v680_v2, %v3241_v28  ;;  %v710_v34 = vmul.f32 %v680_v2, %v680_v2  ;;  %v760_v2 = vperm.slane %v711_v49, %v3238_v29 }
  0xc7   : > { %v890_v12 = vsel %vm746_vm5, %v889_v60, %v888_v33  ;;  %v758_v53 = vperm.slane %v710_v34, %v3241_v28 }
  0xc8   : > { %v909_v15 = vsel %vm781_vm9, %v890_v12, %v908_v62  ;;  %v757_v62 = vperm.slane %v709_v47, %v3238_v29  ;;  %v756_v12 = vsel %vm746_vm5, %v755_v50, %v754_v57 }
  0xc9   : > { %v910_v8 = vsel %vm783_vm10, %v893_v7, %v909_v15  ;;  %v690_v55 = vpop.xlane.xlu2 %689  ;;  %v761_v7 = vperm.slane %v712_v42, %v3241_v28 }
  0xca   : > { %v715_v15 = vmul.f32 %v690_v55, %v690_v55  ;;  %v897_v21 = vperm.slane %v690_v55, %v3238_v29 }
  0xcb   : > { %v762_v25 = vsel %vm746_vm5, %v761_v7, %v760_v2  ;;  %v3333_v7 = vshrl.u32 %v741_v0, 7 }
  0xcc   : > { %v766_v40 = vperm.slane %v715_v15, %v3238_v29 }
  0xcd   : > { %v688_v16 = vpop.xlane.xlu1 %687  ;;  %2345 = vset.pattern.permute.xlu0 %v3333_v7  ;;  %v3337_v2 = vadd.s32 8, %v3333_v7  ;;  %2343 = vset.pattern.permute.xlu1 %v3333_v7 }
  0xce   : > { %v895_v59 = vperm.slane %v688_v16, %v3241_v28  ;;  %v714_v13 = vmul.f32 %v688_v16, %v688_v16  ;;  %v778_v16 = vsel %vm777_vm7, %v753_v56, %v776_v5 }
  0xcf   : > { %v780_v32 = vsel %vm779_vm8, %v756_v12, %v778_v16  ;;  %2344 = vset.pattern.permute.xlu2 %v3337_v2 }
  0xd0   : > { %v764_v19 = vperm.slane %v714_v13, %v3241_v28 }
  0xd2   : > { %v686_v46 = vpop.xlane.xlu0 %685 }
  0xd3   : > { %v894_v17 = vperm.slane %v686_v46, %v3238_v29  ;;  %v713_v33 = vmul.f32 %v686_v46, %v686_v46 }
  0xd4   : > { %v3300_v39 = vpop.xlane.xlu2 %695 }
  0xd5   : > { %v896_v11 = vsel %vm746_vm5, %v895_v59, %v894_v17  ;;  %v763_v63 = vperm.slane %v713_v33, %v3238_v29  ;;  %v718_v38 = vmul.f32 %v3300_v39, %v3300_v39 }
  0xd6   : > { %v911_v61 = vsel %vm785_vm11, %v896_v11, %v910_v8  ;;  %v759_v8 = vsel %vm746_vm5, %v758_v53, %v757_v62 }
  0xd7   : > { %v782_v3 = vsel %vm781_vm9, %v759_v8, %v780_v32  ;;  %v765_v9 = vsel %vm746_vm5, %v764_v19, %v763_v63  ;;  %v770_v57 = vperm.slane %v718_v38, %v3241_v28 }
  0xd8   : > { %v3286_v60 = vpop.xlane.xlu1 %693  ;;  %v784_v26 = vsel %vm783_vm10, %v762_v25, %v782_v3 }
  0xd9   : > { %v786_v37 = vsel %vm785_vm11, %v765_v9, %v784_v26  ;;  %v717_v42 = vmul.f32 %v3286_v60, %v3286_v60 }
  0xdb   : > { %v769_v55 = vperm.slane %v717_v42, %v3238_v29 }
  0xdd   : > { %v692_v22 = vpop.xlane.xlu0 %691  ;;  %v771_v13 = vsel %vm746_vm5, %v770_v57, %v769_v55 }
  0xde   : > { %v716_v59 = vmul.f32 %v692_v22, %v692_v22  ;;  %v898_v41 = vperm.slane %v692_v22, %v3241_v28 }
  0xe0   : > { %v767_v46 = vperm.slane %v716_v59, %v3241_v28  ;;  %v899_v47 = vsel %vm746_vm5, %v898_v41, %v897_v21 }
  0xe1   : > { %v3305_v34 = vsel %vm787_vm12, %v899_v47, %v911_v61  ;;  %v3307_v17 = vpop.xlane.xlu1 %699 }
  0xe2   : > { %v768_v35 = vsel %vm746_vm5, %v767_v46, %v766_v40  ;;  %v720_v49 = vmul.f32 %v3307_v17, %v3307_v17 }
  0xe3   : > { %v788_v11 = vsel %vm787_vm12, %v768_v35, %v786_v37 }
  0xe4   : > { %v793_v10 = vsel %vm3769_vm13, %v788_v11, 0.0  ;;  %v773_v61 = vperm.slane %v720_v49, %v3241_v28 }
  0xe5   : > { %794 = vadd.xlane.f32.xlu2 %v793_v10  ;;  %v3320_v50 = vpop.xlane.xlu0 %697 }
  0xe6   : > { %v719_v62 = vmul.f32 %v3320_v50, %v3320_v50 }
  0xe8   : > { %v772_v53 = vperm.slane %v719_v62, %v3238_v29 }
  0xea   : > { %v774_v33 = vsel %vm746_vm5, %v773_v61, %v772_v53 }
  0xeb   : > { %v789_v56 = vsel %vm775_vm6, %v774_v33, %v771_v13 }
  0xec   : > { %v797_v5 = vsel %vm3768_vm14, %v789_v56, 0.0 }
  0xed   : > { %798 = vadd.xlane.f32.xlu0 %v797_v5  ;;  %v904_v5 = vperm.slane %v3307_v17, %v3241_v28  ;;  %v900_v17 = vperm.slane %v3286_v60, %v3238_v29 }
 0x158   : > { %v795_v12 = vpop.xlane.xlu2 %794 }
 0x159   : > { %2367 = vrsqrt.f32 %v795_v12  ;;  %v824_v15 = vadd.f32 1.0, %v795_v12  ;;  %vm807_vm2 = vcmp.eq.f32.partialorder %v795_v12, inf  ;;  %v810_v38 = vand.u32 2147483648, %v795_v12 }
 0x15a   : > { %vm809_vm4 = vcmp.eq.f32.partialorder %v795_v12, 0.0 }
 0x15b   : > { %2369 = vrcp.f32 %v824_v15  ;;  %v837_v41 = vand.u32 2147483648, %v824_v15  ;;  %v835_v46 = vand.u32 2147483647, %v824_v15  ;;  %vm831_vm1 = vweird.f32 %v824_v15 }
 0x15d   : > { %v838_v49 = vor.u32 1.1754944e-38, %v837_v41  ;;  %vm836_vm14 = vcmp.eq.f32.partialorder %v835_v46, 8.507059e+37 }
 0x15f   : > { %v2368_v8 = vpop.eup %2367 }
 0x160   : > { %v801_v19 = vmul.f32 %v2368_v8, %v795_v12  ;;  %v3341_v63 = vpop.xlane.xlu0 %798 }
 0x161   : > { %v2370_v21 = vpop.eup %2369  ;;  %2371 = vrsqrt.f32 %v3341_v63  ;;  %v825_v16 = vadd.f32 1.0, %v3341_v63 }
 0x162   : > { %v802_v0 = vmul.f32 %v2368_v8, %v801_v19  ;;  %v827_v22 = vmul.f32 %v2370_v21, %v824_v15  ;;  %vm832_vm15 = vweird.f32 %v2370_v21  ;;  %v903_v15 = vperm.slane %v3320_v50, %v3238_v29 }
 0x163   : > { %2373 = vrcp.f32 %v825_v16  ;;  %vm833_vm3 = vmor %vm831_vm1, %vm832_vm15  ;;  %v852_v19 = vand.u32 2147483648, %v825_v16  ;;  %vm846_vm15 = vweird.f32 %v825_v16  ;;  %vm819_vm1 = vcmp.eq.f32.partialorder %v3341_v63, inf }
 0x164   : > { %v803_v25 = vmul.f32 0.5, %v802_v0  ;;  %v828_v32 = vsub.f32 1.0, %v827_v22  ;;  %v850_v0 = vand.u32 2147483647, %v825_v16  ;;  %v905_v41 = vsel %vm746_vm5, %v904_v5, %v903_v15 }
 0x166   : > { %v804_v40 = vsub.f32 1.5, %v803_v25  ;;  %v829_v59 = vmul.f32 %v2370_v21, %v828_v32 }
 0x167   : > { %v2372_v3 = vpop.eup %2371 }
 0x168   : > { %v805_v9 = vmul.f32 %v2368_v8, %v804_v40  ;;  %v830_v47 = vadd.f32 %v2370_v21, %v829_v59  ;;  %v813_v26 = vmul.f32 %v2372_v3, %v3341_v63  ;;  %v901_v40 = vperm.slane %v3300_v39, %v3241_v28 }
 0x169   : > { %v2374_v35 = vpop.eup %2373  ;;  %v853_v59 = vor.u32 1.1754944e-38, %v852_v19 }
 0x16a   : > { %v806_v37 = vmul.f32 %v805_v9, %v795_v12  ;;  %v834_v42 = vsel %vm833_vm3, %v2370_v21, %v830_v47  ;;  %v814_v11 = vmul.f32 %v2372_v3, %v813_v26  ;;  %v842_v10 = vmul.f32 %v2374_v35, %v825_v16 }
 0x16b   : > { %v839_v61 = vsel %vm836_vm14, %v838_v49, %v834_v42  ;;  %vm847_vm13 = vweird.f32 %v2374_v35  ;;  %v822_v16 = vand.u32 2147483648, %v3341_v63  ;;  %v902_v9 = vsel %vm746_vm5, %v901_v40, %v900_v17 }
 0x16c   : > { %v808_v57 = vsel %vm807_vm2, %v795_v12, %v806_v37  ;;  %v815_v62 = vmul.f32 0.5, %v814_v11  ;;  %v843_v53 = vsub.f32 1.0, %v842_v10  ;;  %vm3351_vm14 = vmor %vm846_vm15, %vm847_vm13  ;;  %vm821_vm13 = vcmp.eq.f32.partialorder %v3341_v63, 0.0 }
 0x16d   : > { %v811_v55 = vsel %vm809_vm4, %v810_v38, %v808_v57  ;;  %vm851_vm2 = vcmp.eq.f32.partialorder %v850_v0, 8.507059e+37  ;;  %v913_v47 = vsel %vm775_vm6, %v905_v41, %v902_v9 }
 0x16e   : > { %v840_v13 = vmul.f32 %v839_v61, %v811_v55  ;;  %v816_v33 = vsub.f32 1.5, %v815_v62  ;;  %v844_v56 = vmul.f32 %v2374_v35, %v843_v53 }
 0x170   : > { %v916_v8 = vmul.f32 %v3305_v34, %v840_v13  ;;  %v817_v21 = vmul.f32 %v2372_v3, %v816_v33  ;;  %v845_v12 = vadd.f32 %v2374_v35, %v844_v56 }
 0x172   : > { %v918_v22 = vperm.slane %v916_v8, 0  ;;  %v931_v25 = vperm.slane %v916_v8, 1  ;;  %v818_v50 = vmul.f32 %v817_v21, %v3341_v63  ;;  %v849_v34 = vsel %vm3351_vm14, %v2374_v35, %v845_v12 }
 0x173   : > { %v854_v39 = vsel %vm851_vm2, %v853_v59, %v849_v34  ;;  %v970_v37 = vperm.slane %v916_v8, 4  ;;  %v944_v38 = vperm.slane %v916_v8, 2  ;;  %v1009_v42 = vperm.slane %v916_v8, 7 }
 0x174   : > { %929 = vperm.xlu2 %2344, %v918_v22   ;;  %936 = vperm.xlu0 %2345, %v931_v25   ;;  %v820_v3 = vsel %vm819_vm1, %v3341_v63, %v818_v50  ;;  %v983_v63 = vperm.slane %v916_v8, 5  ;;  %v957_v49 = vperm.slane %v916_v8, 3  ;;  %v996_v11 = vperm.slane %v916_v8, 6 }
 0x175   : > { %v823_v60 = vsel %vm821_vm13, %v822_v16, %v820_v3  ;;  %vm3788_vm1 = vcmask 130048   ;;  %vm3789_vm13 = vcmask 123904  }
 0x176   : > { %v855_v46 = vmul.f32 %v854_v39, %v823_v60 }
 0x178   : > { %v917_v26 = vmul.f32 %v913_v47, %v855_v46 }
 0x17a   : > { %v1022_v35 = vperm.slane %v917_v26, 0  ;;  %v1035_v10 = vperm.slane %v917_v26, 1 }
 0x17c   : > { %942 = vperm.xlu2 %2344, %v931_v25   ;;  %2346 = vset.pattern.permute.xlu0 %v3337_v2 }
 0x17d   : > { %1027 = vperm.xlu1 %2343, %v1022_v35  }
 0x184   : > { %981 = vperm.xlu2 %2344, %v970_v37   ;;  %955 = vperm.xlu0 %2346, %v944_v38  }
 0x185   : > { %923 = vperm.xlu1 %2343, %v918_v22  }
 0x18c   : > { %994 = vperm.xlu2 %2344, %v983_v63   ;;  %2349 = vset.pattern.permute.xlu0 %v3333_v7 }
 0x18d   : > { %975 = vperm.xlu1 %2343, %v970_v37  }
 0x194   : > { %2347 = vset.pattern.permute.xlu2 %v3333_v7  ;;  %1014 = vperm.xlu0 %2349, %v1009_v42  }
 0x195   : > { %988 = vperm.xlu1 %2343, %v983_v63  }
 0x19c   : > { %962 = vperm.xlu2 %2347, %v957_v49   ;;  %2352 = vset.pattern.permute.xlu0 %v3337_v2 }
 0x19d   : > { %949 = vperm.xlu1 %2343, %v944_v38  }
 0x1a4   : > { %1001 = vperm.xlu2 %2347, %v996_v11   ;;  %1046 = vperm.xlu0 %2352, %v1035_v10  }
 0x1a5   : > { %2348 = vset.pattern.permute.xlu1 %v3337_v2 }
 0x1ac   : > { %2350 = vset.pattern.permute.xlu2 %v3337_v2 }
 0x1ad   : > { %968 = vperm.xlu1 %2348, %v957_v49  }
 0x1b4   : > { %1020 = vperm.xlu2 %2350, %v1009_v42  }
 0x1b5   : > { %1007 = vperm.xlu1 %2348, %v996_v11  }
 0x1bc   : > { %1033 = vperm.xlu2 %2350, %v1022_v35  }
 0x1bd   : > { %2351 = vset.pattern.permute.xlu1 %v3333_v7 }
 0x1c4   : > { %2353 = vset.pattern.permute.xlu2 %v3333_v7 }
 0x1c5   : > { %1040 = vperm.xlu1 %2351, %v1035_v10  }
 0x1ce   : > { %v930_v57 = vpop.permute.xlu2 %929 }
 0x1cf   : > { %v1049_v32 = vmul.f32 %v930_v57, %v2807_v52 }
 0x1d6   : > { %v943_v55 = vpop.permute.xlu2 %942 }
 0x1d7   : > { %v1051_v46 = vmul.f32 %v943_v55, %v2770_v24 }
 0x1de   : > { %v982_v62 = vpop.permute.xlu2 %981 }
 0x1df   : > { %v1057_v40 = vmul.f32 %v982_v62, %v3032_v54 }
 0x1e6   : > { %v995_v13 = vpop.permute.xlu2 %994  ;;  %v937_v19 = vpop.permute.xlu0 %936 }
 0x1e7   : > { %v1059_v50 = vmul.f32 %v995_v13, %v2970_v48  ;;  %v1050_v34 = vmul.f32 %v937_v19, %v2671_v14 }
 0x1e9   : > { %v1075_v11 = vadd.f32 %v1051_v46, %v1050_v34 }
 0x1ef   : > { %v1028_v61 = vpop.permute.xlu1 %1027 }
 0x1f0   : > { %v1064_v47 = vmul.f32 %v1028_v61, %v3198_v45 }
 0x1f6   : > { %v963_v56 = vpop.permute.xlu2 %962  ;;  %v956_v0 = vpop.permute.xlu0 %955 }
 0x1f7   : > { %v924_v53 = vpop.permute.xlu1 %923  ;;  %v1054_v26 = vmul.f32 %v963_v56, %v2924_v27  ;;  %v1053_v38 = vmul.f32 %v956_v0, %v2749_v4  ;;  %v1076_v56 = vrot.slane %v1075_v11, 4 }
 0x1f8   : > { %v1048_v16 = vmul.f32 %v924_v53, %v2689_v30 }
 0x1fa   : > { %v1068_v10 = vadd.f32 %v1049_v32, %v1048_v16 }
 0x1fe   : > { %v1002_v15 = vpop.permute.xlu2 %1001 }
 0x1ff   : > { %v976_v33 = vpop.permute.xlu1 %975  ;;  %v1060_v59 = vmul.f32 %v1002_v15, %v3150_v51  ;;  %v1069_v15 = vrot.slane %v1068_v10, 4 }
 0x200   : > { %v1056_v22 = vmul.f32 %v976_v33, %v2842_v20 }
 0x201   : > { %v1070_v32 = vadd.f32 %v1069_v15, %v1068_v10 }
 0x202   : > { %v1096_v35 = vadd.f32 %v1057_v40, %v1056_v22  ;;  %v1077_v40 = vadd.f32 %v1076_v56, %v1075_v11 }
 0x204   : > { %v1097_v55 = vrot.slane %v1096_v35, 4 }
 0x206   : > { %v1015_v37 = vpop.permute.xlu0 %1014  ;;  %v1098_v0 = vadd.f32 %v1097_v55, %v1096_v35 }
 0x207   : > { %v989_v5 = vpop.permute.xlu1 %988  ;;  %v1062_v57 = vmul.f32 %v1015_v37, %v3068_v36 }
 0x208   : > { %v1058_v17 = vmul.f32 %v989_v5, %v2996_v31 }
 0x20a   : > { %v1103_v63 = vadd.f32 %v1059_v50, %v1058_v17 }
 0x20c   : > { %v1104_v33 = vrot.slane %v1103_v63, 4 }
 0x20e   : > { %v1021_v21 = vpop.permute.xlu2 %1020  ;;  %v1105_v22 = vadd.f32 %v1104_v33, %v1103_v63 }
 0x20f   : > { %v950_v8 = vpop.permute.xlu1 %949  ;;  %v1063_v42 = vmul.f32 %v1021_v21, %v3215_v1 }
 0x210   : > { %v1052_v3 = vmul.f32 %v950_v8, %v2625_v43 }
 0x211   : > { %v1117_v61 = vadd.f32 %v1063_v42, %v1062_v57 }
 0x212   : > { %v1082_v62 = vadd.f32 %v1053_v38, %v1052_v3 }
 0x213   : > { %v1118_v21 = vrot.slane %v1117_v61, 4 }
 0x214   : > { %v1083_v8 = vrot.slane %v1082_v62, 4 }
 0x215   : > { %v1119_v3 = vadd.f32 %v1118_v21, %v1117_v61 }
 0x216   : > { %v1034_v25 = vpop.permute.xlu2 %1033  ;;  %v1084_v17 = vadd.f32 %v1083_v8, %v1082_v62  ;;  %v1047_v34 = vpop.permute.xlu0 %1046 }
 0x217   : > { %v1065_v60 = vmul.f32 %v1034_v25, %v3170_v18  ;;  %v1067_v46 = vmul.f32 %v1047_v34, %v3228_v44 }
 0x219   : > { %v1124_v53 = vadd.f32 %v1065_v60, %v1064_v47 }
 0x21b   : > { %v1125_v19 = vrot.slane %v1124_v53, 4 }
 0x21d   : > { %v1126_v50 = vadd.f32 %v1125_v19, %v1124_v53 }
 0x21f   : > { %v969_v12 = vpop.permute.xlu1 %968  ;;  %v1127_v35 = vrot.slane %v1126_v50, 2 }
 0x220   : > { %v1055_v39 = vmul.f32 %v969_v12, %v2888_v58 }
 0x222   : > { %v1089_v13 = vadd.f32 %v1055_v39, %v1054_v26  ;;  %v1078_v39 = vrot.slane %v1077_v40, 2  ;;  %v1085_v26 = vrot.slane %v1084_v17, 2 }
 0x224   : > { %v1090_v12 = vrot.slane %v1089_v13, 4  ;;  %v1079_v57 = vadd.f32 %v1078_v39, %v1077_v40  ;;  %v1086_v53 = vadd.f32 %v1085_v26, %v1084_v17 }
 0x226   : > { %v1091_v16 = vadd.f32 %v1090_v12, %v1089_v13  ;;  %v1128_v13 = vadd.f32 %v1127_v35, %v1126_v50  ;;  %v1080_v19 = vrot.slane %v1079_v57, 1  ;;  %v1087_v21 = vrot.slane %v1086_v53, 1 }
 0x227   : > { %v1008_v41 = vpop.permute.xlu1 %1007 }
 0x228   : > { %v1061_v9 = vmul.f32 %v1008_v41, %v3104_v6  ;;  %v1106_v41 = vrot.slane %v1105_v22, 2  ;;  %v1092_v37 = vrot.slane %v1091_v16, 2  ;;  %v1129_v34 = vrot.slane %v1128_v13, 1 }
 0x229   : > { %v3403_v50 = vadd.f32 %v1080_v19, %v1079_v57 }
 0x22a   : > { %v1110_v49 = vadd.f32 %v1061_v9, %v1060_v59  ;;  %v1099_v59 = vrot.slane %v1098_v0, 2  ;;  %v1071_v9 = vrot.slane %v1070_v32, 2  ;;  %v1107_v42 = vadd.f32 %v1106_v41, %v1105_v22 }
 0x22b   : > { %v1093_v55 = vadd.f32 %v1092_v37, %v1091_v16  ;;  %v3407_v41 = vadd.f32 %v1087_v21, %v1086_v53 }
 0x22c   : > { %v1111_v5 = vrot.slane %v1110_v49, 4  ;;  %v1100_v63 = vadd.f32 %v1099_v59, %v1098_v0  ;;  %v1072_v62 = vadd.f32 %v1071_v9, %v1070_v32 }
 0x22d   : > { %v1094_v0 = vrot.slane %v1093_v55, 1 }
 0x22e   : > { %v1112_v25 = vadd.f32 %v1111_v5, %v1110_v49  ;;  %v1120_v49 = vrot.slane %v1119_v3, 2  ;;  %v1101_v61 = vrot.slane %v1100_v63, 1  ;;  %v1108_v5 = vrot.slane %v1107_v42, 1 }
 0x22f   : > { %v1073_v12 = vrot.slane %v1072_v62, 1 }
 0x230   : > { %v1113_v60 = vrot.slane %v1112_v25, 2  ;;  %v1121_v56 = vadd.f32 %v1120_v49, %v1119_v3  ;;  %v3397_v59 = vadd.f32 %v1101_v61, %v1100_v63  ;;  %v3409_v3 = vadd.f32 %v1129_v34, %v1128_v13 }
 0x231   : > { %v3405_v16 = vadd.f32 %v1073_v12, %v1072_v62 }
 0x232   : > { %v1114_v11 = vadd.f32 %v1113_v60, %v1112_v25  ;;  %v3399_v25 = vadd.f32 %v1108_v5, %v1107_v42  ;;  %v1122_v40 = vrot.slane %v1121_v56, 1  ;;  %v3411_v60 = vadd.f32 %v1094_v0, %v1093_v55 }
 0x233   : > { %v1148_v9 = vmax.f32 %v3405_v16, %v3397_v59 }
 0x234   : > { %v1115_v15 = vrot.slane %v1114_v11, 1 }
 0x235   : > { %v1152_v37 = vmax.f32 %v1148_v9, %v3409_v3 }
 0x236   : > { %v3401_v32 = vadd.f32 %v1115_v15, %v1114_v11 }
 0x237   : > { %v1041_v47 = vpop.permute.xlu1 %1040 }
 0x238   : > { %v1066_v38 = vmul.f32 %v1041_v47, %v3233_v23  ;;  %v3417_v47 = vadd.f32 %v1122_v40, %v1121_v56  ;;  %v1150_v26 = vmax.f32 %v3407_v41, %v3401_v32 }
 0x23a   : > { %v1131_v10 = vadd.f32 %v1067_v46, %v1066_v38  ;;  %v1149_v46 = vmax.f32 %v3403_v50, %v3399_v25  ;;  %v1151_v38 = vmax.f32 %v3411_v60, %v3417_v47 }
 0x23c   : > { %v1132_v33 = vrot.slane %v1131_v10, 4  ;;  %v1155_v42 = vmax.f32 %v1150_v26, %v1151_v38 }
 0x23e   : > { %v1133_v8 = vadd.f32 %v1132_v33, %v1131_v10 }
 0x240   : > { %v1134_v22 = vrot.slane %v1133_v8, 2 }
 0x242   : > { %v1135_v17 = vadd.f32 %v1134_v22, %v1133_v8 }
 0x244   : > { %v1136_v39 = vrot.slane %v1135_v17, 1 }
 0x246   : > { %v3421_v35 = vadd.f32 %v1136_v39, %v1135_v17 }
 0x248   : > { %v1153_v63 = vmax.f32 %v1149_v46, %v3421_v35 }
 0x24a   : > { %v1154_v49 = vmax.f32 %v1152_v37, %v1153_v63 }
 0x24c   : > { %v1156_v11 = vmax.f32 %v1154_v49, %v1155_v42 }
 0x24e   : > { %v1165_v10 = vsub.f32 %v3409_v3, %v1156_v11  ;;  %v1166_v57 = vsub.f32 %v3421_v35, %v1156_v11  ;;  %v1157_v62 = vsub.f32 %v3405_v16, %v1156_v11  ;;  %v1158_v53 = vsub.f32 %v3403_v50, %v1156_v11 }
 0x24f   : > { %v1159_v13 = vsub.f32 %v3407_v41, %v1156_v11  ;;  %v1160_v55 = vsub.f32 %v3411_v60, %v1156_v11  ;;  %v1161_v5 = vsub.f32 %v3397_v59, %v1156_v11  ;;  %v1162_v56 = vsub.f32 %v3399_v25, %v1156_v11 }
 0x250   : > { %v1183_v33 = vmul.f32 1.442695, %v1165_v10  ;;  %v1185_v61 = vmul.f32 1.442695, %v1166_v57  ;;  %v1167_v15 = vmul.f32 1.442695, %v1157_v62  ;;  %v1163_v19 = vsub.f32 %v3401_v32, %v1156_v11 }
 0x251   : > { %v1169_v8 = vmul.f32 1.442695, %v1158_v53  ;;  %v1171_v12 = vmul.f32 1.442695, %v1159_v13  ;;  %v1164_v21 = vsub.f32 %v3417_v47, %v1156_v11  ;;  %v1173_v34 = vmul.f32 1.442695, %v1160_v55 }
 0x252   : > { %2375 = vpow2.f32 %v1183_v33  ;;  %v1175_v0 = vmul.f32 1.442695, %v1161_v5  ;;  %v1177_v22 = vmul.f32 1.442695, %v1162_v56  ;;  %v1179_v40 = vmul.f32 1.442695, %v1163_v19 }
 0x253   : > { %2377 = vpow2.f32 %v1185_v61  ;;  %v1181_v17 = vmul.f32 1.442695, %v1164_v21 }
 0x254   : > { %2379 = vpow2.f32 %v1167_v15 }
 0x255   : > { %2381 = vpow2.f32 %v1169_v8 }
 0x256   : > { %2383 = vpow2.f32 %v1171_v12 }
 0x257   : > { %2385 = vpow2.f32 %v1173_v34 }
 0x258   : > { %v3437_v39 = vpop.eup %2375  ;;  %2387 = vpow2.f32 %v1175_v0 }
 0x259   : > { %v3439_v9 = vpop.eup %2377  ;;  %2389 = vpow2.f32 %v1177_v22 }
 0x25a   : > { %v2380_v46 = vpop.eup %2379  ;;  %2391 = vpow2.f32 %v1179_v40  ;;  %v1211_v42 = vrot.slane %v3439_v9, 7 }
 0x25b   : > { %v2382_v26 = vpop.eup %2381  ;;  %2393 = vpow2.f32 %v1181_v17 }
 0x25c   : > { %v2384_v37 = vpop.eup %2383  ;;  %v1197_v38 = vrot.slane %v2382_v26, 7  ;;  %v1212_v56 = vsel %vm775_vm6, %v1211_v42, %v3437_v39 }
 0x25d   : > { %v2386_v63 = vpop.eup %2385  ;;  %v1199_v49 = vrot.slane %v2384_v37, 6  ;;  %v1215_v34 = vsel %vm617_vm0, %v1212_v56, 0.0 }
 0x25e   : > { %v2388_v11 = vpop.eup %2387  ;;  %v1198_v10 = vsel %vm775_vm6, %v1197_v38, %v2380_v46  ;;  %v1201_v57 = vrot.slane %v2386_v63, 5 }
 0x25f   : > { %v2390_v62 = vpop.eup %2389  ;;  %v1200_v53 = vsel %vm777_vm7, %v1199_v49, %v1198_v10  ;;  %v1203_v13 = vrot.slane %v2388_v11, 4 }
 0x260   : > { %v3444_v55 = vpop.eup %2391  ;;  %v1202_v33 = vsel %vm779_vm8, %v1201_v57, %v1200_v53  ;;  %v1205_v61 = vrot.slane %v2390_v62, 3 }
 0x261   : > { %v2394_v5 = vpop.eup %2393  ;;  %v1204_v15 = vsel %vm781_vm9, %v1203_v13, %v1202_v33  ;;  %v1207_v8 = vrot.slane %v3444_v55, 2 }
 0x262   : > { %v1206_v19 = vsel %vm783_vm10, %v1205_v61, %v1204_v15  ;;  %v1209_v12 = vrot.slane %v2394_v5, 1 }
 0x263   : > { %v1208_v21 = vsel %vm785_vm11, %v1207_v8, %v1206_v19 }
 0x264   : > { %v1210_v0 = vsel %vm787_vm12, %v1209_v12, %v1208_v21 }
 0x265   : > { %v1216_v22 = vadd.f32 %v1215_v34, %v1210_v0 }
 0x267   : > { %v1217_v40 = vrot.slane %v1216_v22, 4 }
 0x269   : > { %v1218_v17 = vadd.f32 %v1217_v40, %v1216_v22 }
 0x26b   : > { %v1219_v38 = vrot.slane %v1218_v17, 2 }
 0x26d   : > { %v1220_v49 = vadd.f32 %v1219_v38, %v1218_v17 }
 0x26f   : > { %v1221_v10 = vrot.slane %v1220_v49, 1 }
 0x271   : > { %v1222_v42 = vadd.f32 %v1221_v10, %v1220_v49 }
 0x273   : > { %v1223_v57 = vperm.slane %v1222_v42, 0 }
 0x275   : > { %2395 = vrcp.f32 %v1223_v57  ;;  %v1235_v61 = vand.u32 2147483648, %v1223_v57  ;;  %v1233_v8 = vand.u32 2147483647, %v1223_v57  ;;  %vm1229_vm4 = vweird.f32 %v1223_v57 }
 0x277   : > { %v1236_v56 = vor.u32 1.1754944e-38, %v1235_v61  ;;  %vm1234_vm14 = vcmp.eq.f32.partialorder %v1233_v8, 8.507059e+37 }
 0x27b   : > { %v2396_v53 = vpop.eup %2395 }
 0x27c   : > { %v1225_v13 = vmul.f32 %v2396_v53, %v1223_v57  ;;  %vm1230_vm3 = vweird.f32 %v2396_v53 }
 0x27d   : > { %vm1231_vm15 = vmor %vm1229_vm4, %vm1230_vm3 }
 0x27e   : > { %v1226_v33 = vsub.f32 1.0, %v1225_v13 }
 0x280   : > { %v1227_v15 = vmul.f32 %v2396_v53, %v1226_v33 }
 0x282   : > { %v1228_v19 = vadd.f32 %v2396_v53, %v1227_v15 }
 0x284   : > { %v1232_v12 = vsel %vm1231_vm15, %v2396_v53, %v1228_v19 }
 0x285   : > { %v1237_v21 = vsel %vm1234_vm14, %v1236_v56, %v1232_v12 }
 0x286   : > { %v1239_v34 = vmul.f32 %v2382_v26, %v1237_v21  ;;  %v1238_v0 = vmul.f32 %v2380_v46, %v1237_v21  ;;  %v1242_v17 = vmul.f32 %v2388_v11, %v1237_v21  ;;  %v1240_v42 = vmul.f32 %v2384_v37, %v1237_v21 }
 0x287   : > { %v1243_v46 = vmul.f32 %v2390_v62, %v1237_v21  ;;  %v1241_v33 = vmul.f32 %v2386_v63, %v1237_v21  ;;  %v1245_v19 = vmul.f32 %v2394_v5, %v1237_v21 }
 0x288   : > { %v1249_v22 = vperm.slane %v1239_v34, 0  ;;  %v1248_v40 = vperm.slane %v1238_v0, 0  ;;  %v1252_v57 = vperm.slane %v1242_v17, 0  ;;  %v1250_v13 = vperm.slane %v1240_v42, 0 }
 0x289   : > { %v1253_v61 = vperm.slane %v1243_v46, 0  ;;  %v1251_v15 = vperm.slane %v1241_v33, 0  ;;  %v1255_v12 = vperm.slane %v1245_v19, 0  ;;  %v1246_v34 = vmul.f32 %v3437_v39, %v1237_v21 }
 0x28a   : > { %v1260_v38 = vmul.f32 %v1249_v22, %v2671_v14  ;;  %v1259_v49 = vmul.f32 %v1248_v40, %v2807_v52  ;;  %v1258_v10 = vmul.f32 %v1248_v40, %v2689_v30  ;;  %v1266_v53 = vmul.f32 %v1252_v57, %v2842_v20 }
 0x28b   : > { %v1262_v26 = vmul.f32 %v1250_v13, %v2625_v43  ;;  %v1261_v11 = vmul.f32 %v1249_v22, %v2770_v24  ;;  %v1269_v37 = vmul.f32 %v1253_v61, %v2970_v48  ;;  %v1264_v8 = vmul.f32 %v1251_v15, %v2924_v27 }
 0x28c   : > { %1282 = vadd.xlane.f32.xlu0 %v1260_v38  ;;  %1280 = vadd.xlane.f32.xlu1 %v1259_v49  ;;  %v1263_v56 = vmul.f32 %v1250_v13, %v2749_v4  ;;  %v1272_v63 = vmul.f32 %v1255_v12, %v3068_v36  ;;  %v1267_v62 = vmul.f32 %v1252_v57, %v3032_v54  ;;  %v1256_v5 = vperm.slane %v1246_v34, 0 }
 0x28d   : > { %1278 = vadd.xlane.f32.xlu2 %v1258_v10  ;;  %v1244_v0 = vmul.f32 %v3444_v55, %v1237_v21  ;;  %v1265_v22 = vmul.f32 %v1251_v15, %v2888_v58  ;;  %v1268_v49 = vmul.f32 %v1253_v61, %v2996_v31  ;;  %v1273_v39 = vmul.f32 %v1255_v12, %v3215_v1 }
 0x28e   : > { %v1275_v17 = vmul.f32 %v1256_v5, %v3170_v18  ;;  %v1247_v55 = vmul.f32 %v3439_v9, %v1237_v21  ;;  %v1274_v13 = vmul.f32 %v1256_v5, %v3198_v45 }
 0x28f   : > { %v1254_v40 = vperm.slane %v1244_v0, 0 }
 0x290   : > { %v1257_v42 = vperm.slane %v1247_v55, 0 }
 0x291   : > { %v1270_v38 = vmul.f32 %v1254_v40, %v3150_v51  ;;  %v1271_v10 = vmul.f32 %v1254_v40, %v3104_v6 }
 0x292   : > { %v1276_v57 = vmul.f32 %v1257_v42, %v3233_v23 }
 0x294   : > { %1294 = vadd.xlane.f32.xlu0 %v1266_v53  ;;  %1286 = vadd.xlane.f32.xlu1 %v1262_v26  ;;  %v1277_v53 = vmul.f32 %v1257_v42, %v3228_v44 }
 0x295   : > { %1284 = vadd.xlane.f32.xlu2 %v1261_v11 }
 0x29c   : > { %1300 = vadd.xlane.f32.xlu0 %v1269_v37  ;;  %1290 = vadd.xlane.f32.xlu1 %v1264_v8 }
 0x29d   : > { %1288 = vadd.xlane.f32.xlu2 %v1263_v56 }
 0x2a4   : > { %1306 = vadd.xlane.f32.xlu0 %v1272_v63  ;;  %1296 = vadd.xlane.f32.xlu1 %v1267_v62 }
 0x2a5   : > { %1292 = vadd.xlane.f32.xlu2 %v1265_v22 }
 0x2ac   : > { %1312 = vadd.xlane.f32.xlu0 %v1275_v17  ;;  %1302 = vadd.xlane.f32.xlu1 %v1270_v38 }
 0x2ad   : > { %1298 = vadd.xlane.f32.xlu2 %v1268_v49 }
 0x2b4   : > { %1308 = vadd.xlane.f32.xlu1 %v1273_v39 }
 0x2b5   : > { %1304 = vadd.xlane.f32.xlu2 %v1271_v10 }
 0x2bc   : > { %1314 = vadd.xlane.f32.xlu1 %v1276_v57 }
 0x2bd   : > { %1310 = vadd.xlane.f32.xlu2 %v1274_v13 }
 0x2c5   : > { %1316 = vadd.xlane.f32.xlu2 %v1277_v53 }
 0x2ff   : > { %v1281_v26 = vpop.xlane.xlu1 %1280  ;;  %v1283_v11 = vpop.xlane.xlu0 %1282 }
 0x300   : > { %v1481_v46 = vperm.slane %v1281_v26, %v3241_v28  ;;  %v1279_v33 = vpop.xlane.xlu2 %1278  ;;  %v1483_v37 = vperm.slane %v1283_v11, %v3238_v29  ;;  %v1320_v57 = vmul.f32 %v1283_v11, %v1283_v11 }
 0x301   : > { %v1480_v9 = vperm.slane %v1279_v33, %v3238_v29 }
 0x303   : > { %v1482_v21 = vsel %vm746_vm5, %v1481_v46, %v1480_v9  ;;  %v1319_v46 = vmul.f32 %v1281_v26, %v1281_v26 }
 0x307   : > { %v1287_v61 = vpop.xlane.xlu1 %1286  ;;  %v1295_v12 = vpop.xlane.xlu0 %1294 }
 0x308   : > { %v1285_v15 = vpop.xlane.xlu2 %1284  ;;  %v1486_v34 = vperm.slane %v1287_v61, %v3238_v29  ;;  %v1492_v17 = vperm.slane %v1295_v12, %v3238_v29 }
 0x309   : > { %v1484_v8 = vperm.slane %v1285_v15, %v3241_v28  ;;  %v1321_v13 = vmul.f32 %v1285_v15, %v1285_v15 }
 0x30b   : > { %v1485_v19 = vsel %vm746_vm5, %v1484_v8, %v1483_v37  ;;  %v1318_v37 = vmul.f32 %v1279_v33, %v1279_v33 }
 0x30c   : > { %v1510_v56 = vsel %vm775_vm6, %v1485_v19, %v1482_v21  ;;  %v1322_v19 = vmul.f32 %v1287_v61, %v1287_v61 }
 0x30f   : > { %v1291_v63 = vpop.xlane.xlu1 %1290  ;;  %v1301_v39 = vpop.xlane.xlu0 %1300 }
 0x310   : > { %v1289_v62 = vpop.xlane.xlu2 %1288  ;;  %v1489_v55 = vperm.slane %v1291_v63, %v3238_v29  ;;  %v1324_v11 = vmul.f32 %v1291_v63, %v1291_v63  ;;  %v1496_v33 = vperm.slane %v1301_v39, %v3241_v28 }
 0x311   : > { %v1487_v0 = vperm.slane %v1289_v62, %v3241_v28  ;;  %v1323_v9 = vmul.f32 %v1289_v62, %v1289_v62  ;;  %v1358_v62 = vperm.slane %v1318_v37, %v3238_v29 }
 0x313   : > { %v1488_v22 = vsel %vm746_vm5, %v1487_v0, %v1486_v34  ;;  %v1361_v34 = vperm.slane %v1320_v57, %v3238_v29  ;;  %v1362_v0 = vperm.slane %v1321_v13, %v3241_v28  ;;  %v1365_v15 = vperm.slane %v1323_v9, %v3241_v28 }
 0x314   : > { %v1511_v5 = vsel %vm777_vm7, %v1488_v22, %v1510_v56  ;;  %v1329_v57 = vmul.f32 %v1301_v39, %v1301_v39 }
 0x317   : > { %v1297_v40 = vpop.xlane.xlu1 %1296  ;;  %v1307_v63 = vpop.xlane.xlu0 %1306 }
 0x318   : > { %v1493_v38 = vperm.slane %v1297_v40, %v3241_v28  ;;  %v1293_v49 = vpop.xlane.xlu2 %1292 }
 0x319   : > { %v1490_v10 = vperm.slane %v1293_v49, %v3241_v28  ;;  %v1325_v56 = vmul.f32 %v1293_v49, %v1293_v49  ;;  %v1364_v49 = vperm.slane %v1322_v19, %v3238_v29  ;;  %v1332_v19 = vmul.f32 %v1307_v63, %v1307_v63 }
 0x31a   : > { %v1494_v42 = vsel %vm746_vm5, %v1493_v38, %v1492_v17  ;;  %v1359_v17 = vperm.slane %v1319_v46, %v3241_v28  ;;  %v1327_v38 = vmul.f32 %v1297_v40, %v1297_v40  ;;  %v1367_v40 = vperm.slane %v1324_v11, %v3238_v29 }
 0x31b   : > { %v1491_v53 = vsel %vm746_vm5, %v1490_v10, %v1489_v55  ;;  %v1368_v55 = vperm.slane %v1325_v56, %v3241_v28 }
 0x31c   : > { %v1512_v21 = vsel %vm779_vm8, %v1491_v53, %v1511_v5  ;;  %v1326_v5 = vmul.f32 %v1295_v12, %v1295_v12  ;;  %v1366_v53 = vsel %vm746_vm5, %v1365_v15, %v1364_v49  ;;  %v1371_v12 = vperm.slane %v1327_v38, %v3241_v28 }
 0x31d   : > { %v1513_v8 = vsel %vm781_vm9, %v1494_v42, %v1512_v21  ;;  %v1363_v42 = vsel %vm746_vm5, %v1362_v0, %v1361_v34  ;;  %v1360_v9 = vsel %vm746_vm5, %v1359_v17, %v1358_v62  ;;  %v1369_v39 = vsel %vm746_vm5, %v1368_v55, %v1367_v40 }
 0x31e   : > { %v1370_v21 = vperm.slane %v1326_v5, %v3238_v29  ;;  %v1388_v37 = vsel %vm775_vm6, %v1363_v42, %v1360_v9  ;;  %v1374_v34 = vperm.slane %v1329_v57, %v3241_v28  ;;  %v1501_v38 = vperm.slane %v1307_v63, %v3238_v29 }
 0x31f   : > { %v1303_v22 = vpop.xlane.xlu1 %1302  ;;  %v1389_v0 = vsel %vm777_vm7, %v1366_v53, %v1388_v37  ;;  %v1379_v55 = vperm.slane %v1332_v19, %v3238_v29 }
 0x320   : > { %v1299_v26 = vpop.xlane.xlu2 %1298  ;;  %v1330_v11 = vmul.f32 %v1303_v22, %v1303_v22  ;;  %v1498_v5 = vperm.slane %v1303_v22, %v3238_v29  ;;  %v1390_v49 = vsel %vm779_vm8, %v1369_v39, %v1389_v0 }
 0x321   : > { %v1495_v61 = vperm.slane %v1299_v26, %v3238_v29  ;;  %v1328_v10 = vmul.f32 %v1299_v26, %v1299_v26 }
 0x322   : > { %v1376_v63 = vperm.slane %v1330_v11, %v3238_v29 }
 0x323   : > { %v1497_v13 = vsel %vm746_vm5, %v1496_v33, %v1495_v61  ;;  %v1373_v56 = vperm.slane %v1328_v10, %v3238_v29 }
 0x324   : > { %v1514_v46 = vsel %vm783_vm10, %v1497_v13, %v1513_v8  ;;  %v1372_v8 = vsel %vm746_vm5, %v1371_v12, %v1370_v21 }
 0x325   : > { %v1375_v57 = vsel %vm746_vm5, %v1374_v34, %v1373_v56  ;;  %v1391_v12 = vsel %vm781_vm9, %v1372_v8, %v1390_v49 }
 0x326   : > { %v1392_v37 = vsel %vm783_vm10, %v1375_v57, %v1391_v12 }
 0x327   : > { %v1309_v15 = vpop.xlane.xlu1 %1308 }
 0x328   : > { %v1333_v17 = vmul.f32 %v1309_v15, %v1309_v15  ;;  %v1502_v26 = vperm.slane %v1309_v15, %v3241_v28  ;;  %v1305_v62 = vpop.xlane.xlu2 %1304 }
 0x329   : > { %v1331_v33 = vmul.f32 %v1305_v62, %v1305_v62  ;;  %v1499_v61 = vperm.slane %v1305_v62, %v3241_v28 }
 0x32a   : > { %v1380_v10 = vperm.slane %v1333_v17, %v3241_v28  ;;  %v1503_v42 = vsel %vm746_vm5, %v1502_v26, %v1501_v38 }
 0x32b   : > { %v1377_v13 = vperm.slane %v1331_v33, %v3241_v28  ;;  %v1500_v40 = vsel %vm746_vm5, %v1499_v61, %v1498_v5 }
 0x32c   : > { %v1515_v22 = vsel %vm785_vm11, %v1500_v40, %v1514_v46  ;;  %v1381_v53 = vsel %vm746_vm5, %v1380_v10, %v1379_v55  ;;  %v3543_v46 = vpop.xlane.xlu0 %1312 }
 0x32d   : > { %v1516_v9 = vsel %vm787_vm12, %v1503_v42, %v1515_v22  ;;  %v1378_v21 = vsel %vm746_vm5, %v1377_v13, %v1376_v63  ;;  %v1335_v15 = vmul.f32 %v3543_v46, %v3543_v46 }
 0x32e   : > { %v1393_v19 = vsel %vm785_vm11, %v1378_v21, %v1392_v37 }
 0x32f   : > { %v1394_v39 = vsel %vm787_vm12, %v1381_v53, %v1393_v19  ;;  %v3545_v0 = vpop.xlane.xlu1 %1314  ;;  %v1383_v62 = vperm.slane %v1335_v15, %v3241_v28 }
 0x330   : > { %v3540_v56 = vpop.xlane.xlu2 %1310  ;;  %v1398_v34 = vsel %vm3788_vm1, %v1394_v39, 0.0  ;;  %v1336_v38 = vmul.f32 %v3545_v0, %v3545_v0 }
 0x331   : > { %1399 = vadd.xlane.f32.xlu0 %v1398_v34  ;;  %v1334_v11 = vmul.f32 %v3540_v56, %v3540_v56 }
 0x332   : > { %v1385_v5 = vperm.slane %v1336_v38, %v3238_v29 }
 0x333   : > { %v1382_v17 = vperm.slane %v1334_v11, %v3238_v29 }
 0x335   : > { %v1384_v61 = vsel %vm746_vm5, %v1383_v62, %v1382_v17 }
 0x338   : > { %v3553_v8 = vpop.xlane.xlu2 %1316 }
 0x339   : > { %v1337_v26 = vmul.f32 %v3553_v8, %v3553_v8 }
 0x33b   : > { %v1386_v33 = vperm.slane %v1337_v26, %v3241_v28 }
 0x33d   : > { %v1387_v49 = vsel %vm746_vm5, %v1386_v33, %v1385_v5 }
 0x33e   : > { %v1395_v55 = vsel %vm775_vm6, %v1387_v49, %v1384_v61 }
 0x33f   : > { %v1401_v10 = vsel %vm3789_vm13, %v1395_v55, 0.0 }
 0x340   : > { %1402 = vadd.xlane.f32.xlu1 %v1401_v10 }
 0x3a4   : > { %v1400_v42 = vpop.xlane.xlu0 %1399 }
 0x3a5   : > { %2397 = vrsqrt.f32 %v1400_v42  ;;  %v1428_v57 = vadd.f32 1.0, %v1400_v42  ;;  %vm1411_vm4 = vcmp.eq.f32.partialorder %v1400_v42, inf  ;;  %v1414_v26 = vand.u32 2147483648, %v1400_v42 }
 0x3a6   : > { %vm1413_vm14 = vcmp.eq.f32.partialorder %v1400_v42, 0.0 }
 0x3a7   : > { %2399 = vrcp.f32 %v1428_v57  ;;  %v1441_v39 = vand.u32 2147483648, %v1428_v57  ;;  %v1439_v11 = vand.u32 2147483647, %v1428_v57  ;;  %vm1435_vm3 = vweird.f32 %v1428_v57 }
 0x3a9   : > { %v1442_v5 = vor.u32 1.1754944e-38, %v1441_v39  ;;  %vm1440_vm1 = vcmp.eq.f32.partialorder %v1439_v11, 8.507059e+37 }
 0x3ab   : > { %v2398_v63 = vpop.eup %2397 }
 0x3ac   : > { %v1405_v13 = vmul.f32 %v2398_v63, %v1400_v42 }
 0x3ad   : > { %v2400_v40 = vpop.eup %2399 }
 0x3ae   : > { %v1406_v22 = vmul.f32 %v2398_v63, %v1405_v13  ;;  %v1431_v53 = vmul.f32 %v2400_v40, %v1428_v57  ;;  %vm1436_vm2 = vweird.f32 %v2400_v40 }
 0x3af   : > { %vm1437_vm15 = vmor %vm1435_vm3, %vm1436_vm2 }
 0x3b0   : > { %v1407_v12 = vmul.f32 0.5, %v1406_v22  ;;  %v1432_v21 = vsub.f32 1.0, %v1431_v53 }
 0x3b2   : > { %v1408_v37 = vsub.f32 1.5, %v1407_v12  ;;  %v1433_v19 = vmul.f32 %v2400_v40, %v1432_v21 }
 0x3b3   : > { %v1403_v15 = vpop.xlane.xlu1 %1402 }
 0x3b4   : > { %v1409_v34 = vmul.f32 %v2398_v63, %v1408_v37  ;;  %v1434_v38 = vadd.f32 %v2400_v40, %v1433_v19  ;;  %2401 = vrsqrt.f32 %v1403_v15  ;;  %v1429_v13 = vadd.f32 1.0, %v1403_v15 }
 0x3b5   : > { %vm1423_vm2 = vcmp.eq.f32.partialorder %v1403_v15, inf }
 0x3b6   : > { %v1410_v17 = vmul.f32 %v1409_v34, %v1400_v42  ;;  %v1438_v62 = vsel %vm1437_vm15, %v2400_v40, %v1434_v38  ;;  %2403 = vrcp.f32 %v1429_v13  ;;  %vm1450_vm3 = vweird.f32 %v1429_v13 }
 0x3b7   : > { %v1443_v49 = vsel %vm1440_vm1, %v1442_v5, %v1438_v62  ;;  %v1454_v5 = vand.u32 2147483647, %v1429_v13  ;;  %vm1425_vm15 = vcmp.eq.f32.partialorder %v1403_v15, 0.0 }
 0x3b8   : > { %v1412_v33 = vsel %vm1411_vm4, %v1400_v42, %v1410_v17 }
 0x3b9   : > { %v1415_v61 = vsel %vm1413_vm14, %v1414_v26, %v1412_v33  ;;  %v1456_v26 = vand.u32 2147483648, %v1429_v13  ;;  %v1426_v33 = vand.u32 2147483648, %v1403_v15  ;;  %vm1455_vm14 = vcmp.eq.f32.partialorder %v1454_v5, 8.507059e+37 }
 0x3ba   : > { %v1444_v55 = vmul.f32 %v1443_v49, %v1415_v61  ;;  %v2402_v63 = vpop.eup %2401  ;;  %v1508_v61 = vperm.slane %v3553_v8, %v3241_v28 }
 0x3bb   : > { %v1417_v53 = vmul.f32 %v2402_v63, %v1403_v15 }
 0x3bc   : > { %v3565_v10 = vmul.f32 %v1516_v9, %v1444_v55  ;;  %v2404_v12 = vpop.eup %2403 }
 0x3bd   : > { %v1418_v40 = vmul.f32 %v2402_v63, %v1417_v53  ;;  %v1446_v9 = vmul.f32 %v2404_v12, %v1429_v13  ;;  %vm1451_vm13 = vweird.f32 %v2404_v12  ;;  %v1505_v13 = vperm.slane %v3543_v46, %v3241_v28 }
 0x3be   : > { %v1522_v22 = vperm.slane %v3565_v10, 0  ;;  %v1535_v57 = vperm.slane %v3565_v10, 1  ;;  %v1574_v42 = vperm.slane %v3565_v10, 4  ;;  %v1587_v38 = vperm.slane %v3565_v10, 5  ;;  %vm1452_vm4 = vmor %vm1450_vm3, %vm1451_vm13 }
 0x3bf   : > { %v1419_v21 = vmul.f32 0.5, %v1418_v40  ;;  %v1447_v19 = vsub.f32 1.0, %v1446_v9  ;;  %v1600_v46 = vperm.slane %v3565_v10, 6  ;;  %v1613_v9 = vperm.slane %v3565_v10, 7 }
 0x3c0   : > { %1533 = vperm.xlu0 %2352, %v1522_v22   ;;  %1527 = vperm.xlu2 %2353, %v1522_v22   ;;  %v1507_v22 = vperm.slane %v3545_v0, %v3238_v29 }
 0x3c1   : > { %1540 = vperm.xlu1 %2351, %v1535_v57   ;;  %v1420_v37 = vsub.f32 1.5, %v1419_v21  ;;  %v1448_v34 = vmul.f32 %v2404_v12, %v1447_v19 }
 0x3c2   : > { %v1509_v40 = vsel %vm746_vm5, %v1508_v61, %v1507_v22 }
 0x3c3   : > { %v1421_v39 = vmul.f32 %v2402_v63, %v1420_v37  ;;  %v1449_v17 = vadd.f32 %v2404_v12, %v1448_v34  ;;  %v1457_v63 = vor.u32 1.1754944e-38, %v1456_v26 }
 0x3c5   : > { %v1422_v11 = vmul.f32 %v1421_v39, %v1403_v15  ;;  %v1453_v49 = vsel %vm1452_vm4, %v2404_v12, %v1449_v17 }
 0x3c6   : > { %v1458_v53 = vsel %vm1455_vm14, %v1457_v63, %v1453_v49 }
 0x3c7   : > { %v1424_v62 = vsel %vm1423_vm2, %v1403_v15, %v1422_v11 }
 0x3c8   : > { %1546 = vperm.xlu0 %2352, %v1535_v57   ;;  %1579 = vperm.xlu2 %2353, %v1574_v42   ;;  %v1427_v55 = vsel %vm1425_vm15, %v1426_v33, %v1424_v62  ;;  %v1504_v57 = vperm.slane %v3540_v56, %v3238_v29  ;;  %v1561_v56 = vperm.slane %v3565_v10, 3 }
 0x3c9   : > { %2354 = vset.pattern.permute.xlu1 %v3337_v2  ;;  %v1459_v8 = vmul.f32 %v1458_v53, %v1427_v55 }
 0x3ca   : > { %v1506_v15 = vsel %vm746_vm5, %v1505_v13, %v1504_v57 }
 0x3cb   : > { %v1517_v0 = vsel %vm775_vm6, %v1509_v40, %v1506_v15 }
 0x3cc   : > { %v1521_v12 = vmul.f32 %v1517_v0, %v1459_v8 }
 0x3ce   : > { %v1626_v21 = vperm.slane %v1521_v12, 0  ;;  %v1639_v37 = vperm.slane %v1521_v12, 1 }
 0x3d0   : > { %2355 = vset.pattern.permute.xlu0 %v3333_v7  ;;  %2356 = vset.pattern.permute.xlu2 %v3337_v2 }
 0x3d1   : > { %1585 = vperm.xlu1 %2354, %v1574_v42   ;;  %v1548_v42 = vperm.slane %v3565_v10, 2 }
 0x3d8   : > { %1592 = vperm.xlu0 %2355, %v1587_v38   ;;  %1598 = vperm.xlu2 %2356, %v1587_v38  }
 0x3d9   : > { %2357 = vset.pattern.permute.xlu1 %v3333_v7 }
 0x3e0   : > { %2358 = vset.pattern.permute.xlu0 %v3337_v2  ;;  %1559 = vperm.xlu2 %2356, %v1548_v42  }
 0x3e1   : > { %1553 = vperm.xlu1 %2357, %v1548_v42  }
 0x3e8   : > { %1572 = vperm.xlu0 %2358, %v1561_v56   ;;  %1637 = vperm.xlu2 %2356, %v1626_v21  }
 0x3e9   : > { %1566 = vperm.xlu1 %2357, %v1561_v56  }
 0x3f0   : > { %2359 = vset.pattern.permute.xlu0 %v3333_v7  ;;  %2360 = vset.pattern.permute.xlu2 %v3333_v7 }
 0x3f1   : > { %2361 = vset.pattern.permute.xlu1 %v3337_v2 }
 0x3f8   : > { %1605 = vperm.xlu2 %2360, %v1600_v46   ;;  %1631 = vperm.xlu0 %2359, %v1626_v21  }
 0x3f9   : > { %1611 = vperm.xlu1 %2361, %v1600_v46  }
 0x400   : > { %1618 = vperm.xlu2 %2360, %v1613_v9   ;;  %2364 = vset.pattern.permute.xlu0 %v3337_v2 }
 0x401   : > { %1624 = vperm.xlu1 %2361, %v1613_v9  }
 0x408   : > { %2363 = vset.pattern.permute.xlu2 %v3337_v2 }
 0x409   : > { %2362 = vset.pattern.permute.xlu1 %v3333_v7 }
 0x410   : > { %1650 = vperm.xlu2 %2363, %v1639_v37  }
 0x411   : > { %1644 = vperm.xlu1 %2362, %v1639_v37  }
 0x41a   : > { %v1528_v19 = vpop.permute.xlu2 %1527 }
 0x41b   : > { %v1652_v57 = vmul.f32 %v1528_v19, %v2689_v30 }
 0x422   : > { %v1580_v39 = vpop.permute.xlu2 %1579 }
 0x423   : > { %v1660_v53 = vmul.f32 %v1580_v39, %v2842_v20 }
 0x432   : > { %v1599_v11 = vpop.permute.xlu2 %1598  ;;  %v1534_v38 = vpop.permute.xlu0 %1533 }
 0x433   : > { %v1541_v34 = vpop.permute.xlu1 %1540  ;;  %v1653_v13 = vmul.f32 %v1534_v38, %v2807_v52  ;;  %v1663_v40 = vmul.f32 %v1599_v11, %v2970_v48 }
 0x434   : > { %v1654_v21 = vmul.f32 %v1541_v34, %v2671_v14 }
 0x43a   : > { %v1560_v26 = vpop.permute.xlu2 %1559  ;;  %v1547_v62 = vpop.permute.xlu0 %1546 }
 0x43b   : > { %v1655_v42 = vmul.f32 %v1547_v62, %v2770_v24  ;;  %v1672_v62 = vadd.f32 %v1653_v13, %v1652_v57 }
 0x442   : > { %v1638_v5 = vpop.permute.xlu2 %1637 }
 0x443   : > { %v1586_v17 = vpop.permute.xlu1 %1585  ;;  %v1669_v9 = vmul.f32 %v1638_v5, %v3170_v18 }
 0x444   : > { %v1661_v7 = vmul.f32 %v1586_v17, %v3032_v54 }
 0x446   : > { %v1700_v46 = vadd.f32 %v1661_v7, %v1660_v53 }
 0x44a   : > { %v1593_v33 = vpop.permute.xlu0 %1592 }
 0x44b   : > { %v1662_v63 = vmul.f32 %v1593_v33, %v2996_v31  ;;  %v1679_v33 = vadd.f32 %v1655_v42, %v1654_v21 }
 0x44d   : > { %v1707_v37 = vadd.f32 %v1663_v40, %v1662_v63  ;;  %v1673_v40 = vrot.slane %v1672_v62, 4 }
 0x44f   : > { %v1708_v5 = vrot.slane %v1707_v37, 4  ;;  %v1674_v13 = vadd.f32 %v1673_v40, %v1672_v62 }
 0x452   : > { %v1606_v49 = vpop.permute.xlu2 %1605 }
 0x453   : > { %v1554_v10 = vpop.permute.xlu1 %1553  ;;  %v1664_v11 = vmul.f32 %v1606_v49, %v3150_v51 }
 0x454   : > { %v1656_v39 = vmul.f32 %v1554_v10, %v2625_v43  ;;  %v1680_v10 = vrot.slane %v1679_v33, 4 }
 0x456   : > { %v1681_v42 = vadd.f32 %v1680_v10, %v1679_v33 }
 0x45a   : > { %v1573_v55 = vpop.permute.xlu0 %1572  ;;  %v1619_v8 = vpop.permute.xlu2 %1618 }
 0x45b   : > { %v1567_v61 = vpop.permute.xlu1 %1566  ;;  %v1659_v15 = vmul.f32 %v1573_v55, %v2888_v58  ;;  %v1666_v38 = vmul.f32 %v1619_v8, %v3068_v36 }
 0x45c   : > { %v1658_v0 = vmul.f32 %v1567_v61, %v2924_v27  ;;  %v1657_v61 = vmul.f32 %v1560_v26, %v2749_v4 }
 0x45e   : > { %v1693_v55 = vadd.f32 %v1659_v15, %v1658_v0  ;;  %v1686_v63 = vadd.f32 %v1657_v61, %v1656_v39  ;;  %v1675_v39 = vrot.slane %v1674_v13, 2 }
 0x460   : > { %v1694_v29 = vrot.slane %v1693_v55, 4 }
 0x462   : > { %v1695_v26 = vadd.f32 %v1694_v29, %v1693_v55 }
 0x46a   : > { %v1632_v22 = vpop.permute.xlu0 %1631 }
 0x46b   : > { %v1612_v2 = vpop.permute.xlu1 %1611  ;;  %v1668_v12 = vmul.f32 %v1632_v22, %v3198_v45  ;;  %v1701_v22 = vrot.slane %v1700_v46, 4  ;;  %v1709_v45 = vadd.f32 %v1708_v5, %v1707_v37 }
 0x46c   : > { %v1665_v56 = vmul.f32 %v1612_v2, %v3104_v6 }
 0x46d   : > { %v1728_v2 = vadd.f32 %v1669_v9, %v1668_v12  ;;  %v1702_v8 = vadd.f32 %v1701_v22, %v1700_v46 }
 0x46e   : > { %v1714_v34 = vadd.f32 %v1665_v56, %v1664_v11  ;;  %v1710_v56 = vrot.slane %v1709_v45, 2  ;;  %v1682_v11 = vrot.slane %v1681_v42, 2 }
 0x46f   : > { %v1729_v49 = vrot.slane %v1728_v2, 4  ;;  %v1703_v12 = vrot.slane %v1702_v8, 2 }
 0x470   : > { %v1715_v28 = vrot.slane %v1714_v34, 4  ;;  %v1711_v46 = vadd.f32 %v1710_v56, %v1709_v45  ;;  %v1683_v55 = vadd.f32 %v1682_v11, %v1681_v42 }
 0x471   : > { %v1730_v15 = vadd.f32 %v1729_v49, %v1728_v2  ;;  %v1704_v18 = vadd.f32 %v1703_v12, %v1702_v8 }
 0x472   : > { %v1716_v0 = vadd.f32 %v1715_v28, %v1714_v34  ;;  %v1676_v28 = vadd.f32 %v1675_v39, %v1674_v13  ;;  %v1684_v45 = vrot.slane %v1683_v55, 1 }
 0x473   : > { %v1625_v19 = vpop.permute.xlu1 %1624  ;;  %v1731_v61 = vrot.slane %v1730_v15, 2 }
 0x474   : > { %v1667_v17 = vmul.f32 %v1625_v19, %v3215_v1  ;;  %v1687_v19 = vrot.slane %v1686_v63, 4  ;;  %v1717_v1 = vrot.slane %v1716_v0, 2  ;;  %v1677_v8 = vrot.slane %v1676_v28, 1 }
 0x475   : > { %v1732_v34 = vadd.f32 %v1731_v61, %v1730_v15  ;;  %v1685_v15 = vadd.f32 %v1684_v45, %v1683_v55 }
 0x476   : > { %v1721_v7 = vadd.f32 %v1667_v17, %v1666_v38  ;;  %v1688_v21 = vadd.f32 %v1687_v19, %v1686_v63  ;;  %v1651_v38 = vpop.permute.xlu2 %1650  ;;  %v1696_v17 = vrot.slane %v1695_v26, 2  ;;  %v1705_v63 = vrot.slane %v1704_v18, 1 }
 0x477   : > { %v1671_v62 = vmul.f32 %v1651_v38, %v3228_v44  ;;  %v1733_v12 = vrot.slane %v1732_v34, 1 }
 0x478   : > { %v1722_v53 = vrot.slane %v1721_v7, 4  ;;  %v1689_v22 = vrot.slane %v1688_v21, 2  ;;  %v1697_v2 = vadd.f32 %v1696_v17, %v1695_v26  ;;  %v1678_v26 = vadd.f32 %v1677_v8, %v1676_v28 }
 0x47a   : > { %v1723_v57 = vadd.f32 %v1722_v53, %v1721_v7  ;;  %v1718_v7 = vadd.f32 %v1717_v1, %v1716_v0  ;;  %v1712_v53 = vrot.slane %v1711_v46, 1  ;;  %v1690_v40 = vadd.f32 %v1689_v22, %v1688_v21 }
 0x47b   : > { %v1698_v19 = vrot.slane %v1697_v2, 1  ;;  %v1734_v0 = vadd.f32 %v1733_v12, %v1732_v34 }
 0x47c   : > { %v1724_v9 = vrot.slane %v1723_v57, 2  ;;  %v1719_v56 = vrot.slane %v1718_v7, 1 }
 0x47d   : > { %v1699_v1 = vadd.f32 %v1698_v19, %v1697_v2 }
 0x47e   : > { %v1725_v33 = vadd.f32 %v1724_v9, %v1723_v57  ;;  %v1706_v57 = vadd.f32 %v1705_v63, %v1704_v18  ;;  %v1713_v9 = vadd.f32 %v1712_v53, %v1711_v46  ;;  %v1720_v39 = vadd.f32 %v1719_v56, %v1718_v7 }
 0x47f   : > { %v1742_v18 = vadd.f32 %v1678_v26, %v3405_v16  ;;  %v1743_v46 = vadd.f32 %v1685_v15, %v3403_v50 }
 0x480   : > { %v1726_v10 = vrot.slane %v1725_v33, 1  ;;  %v1746_v21 = vadd.f32 %v1706_v57, %v3397_v59  ;;  %v1747_v17 = vadd.f32 %v1713_v9, %v3399_v25  ;;  %v1748_v28 = vadd.f32 %v1720_v39, %v3401_v32 }
 0x482   : > { %v1727_v13 = vadd.f32 %v1726_v10, %v1725_v33  ;;  %v1745_v33 = vadd.f32 %v1699_v1, %v3411_v60  ;;  %v1752_v2 = vmax.f32 %v1742_v18, %v1746_v21  ;;  %v1753_v34 = vmax.f32 %v1743_v46, %v1747_v17 }
 0x483   : > { %v1645_v37 = vpop.permute.xlu1 %1644 }
 0x484   : > { %v1670_v29 = vmul.f32 %v1645_v37, %v3233_v23  ;;  %v1691_v37 = vrot.slane %v1690_v40, 1  ;;  %v1749_v22 = vadd.f32 %v1727_v13, %v3417_v47 }
 0x486   : > { %v1735_v5 = vadd.f32 %v1671_v62, %v1670_v29  ;;  %v1692_v61 = vadd.f32 %v1691_v37, %v1690_v40  ;;  %v1750_v29 = vadd.f32 %v1734_v0, %v3409_v3  ;;  %v1755_v25 = vmax.f32 %v1745_v33, %v1749_v22 }
 0x488   : > { %v1736_v49 = vrot.slane %v1735_v5, 4  ;;  %v1744_v59 = vadd.f32 %v1692_v61, %v3407_v41  ;;  %v1756_v47 = vmax.f32 %v1752_v2, %v1750_v29 }
 0x48a   : > { %v1737_v38 = vadd.f32 %v1736_v49, %v1735_v5  ;;  %v1754_v5 = vmax.f32 %v1744_v59, %v1748_v28 }
 0x48c   : > { %v1738_v42 = vrot.slane %v1737_v38, 2  ;;  %v1759_v16 = vmax.f32 %v1754_v5, %v1755_v25 }
 0x48e   : > { %v1739_v11 = vadd.f32 %v1738_v42, %v1737_v38 }
 0x490   : > { %v1740_v62 = vrot.slane %v1739_v11, 1 }
 0x492   : > { %v1741_v55 = vadd.f32 %v1740_v62, %v1739_v11 }
 0x494   : > { %v1751_v7 = vadd.f32 %v1741_v55, %v3421_v35 }
 0x496   : > { %v1757_v63 = vmax.f32 %v1753_v34, %v1751_v7 }
 0x498   : > { %v1758_v53 = vmax.f32 %v1756_v47, %v1757_v63 }
 0x49a   : > { %v1760_v50 = vmax.f32 %v1758_v53, %v1759_v16 }
 0x49c   : > { %v1769_v40 = vsub.f32 %v1750_v29, %v1760_v50  ;;  %v1770_v60 = vsub.f32 %v1751_v7, %v1760_v50  ;;  %v1761_v10 = vsub.f32 %v1742_v18, %v1760_v50  ;;  %v1762_v3 = vsub.f32 %v1743_v46, %v1760_v50 }
 0x49d   : > { %v1763_v49 = vsub.f32 %v1744_v59, %v1760_v50  ;;  %v1764_v32 = vsub.f32 %v1745_v33, %v1760_v50  ;;  %v1765_v19 = vsub.f32 %v1746_v21, %v1760_v50  ;;  %v1766_v12 = vsub.f32 %v1747_v17, %v1760_v50 }
 0x49e   : > { %v1787_v8 = vmul.f32 1.442695, %v1769_v40  ;;  %v1789_v45 = vmul.f32 1.442695, %v1770_v60  ;;  %v1771_v41 = vmul.f32 1.442695, %v1761_v10  ;;  %v1767_v35 = vsub.f32 %v1748_v28, %v1760_v50 }
 0x49f   : > { %v1773_v56 = vmul.f32 1.442695, %v1762_v3  ;;  %v1775_v38 = vmul.f32 1.442695, %v1763_v49  ;;  %v1768_v57 = vsub.f32 %v1749_v22, %v1760_v50  ;;  %v1777_v9 = vmul.f32 1.442695, %v1764_v32 }
 0x4a0   : > { %2405 = vpow2.f32 %v1787_v8  ;;  %v1779_v37 = vmul.f32 1.442695, %v1765_v19  ;;  %v1781_v13 = vmul.f32 1.442695, %v1766_v12  ;;  %v1783_v42 = vmul.f32 1.442695, %v1767_v35 }
 0x4a1   : > { %2407 = vpow2.f32 %v1789_v45  ;;  %v1785_v26 = vmul.f32 1.442695, %v1768_v57 }
 0x4a2   : > { %2409 = vpow2.f32 %v1771_v41 }
 0x4a3   : > { %2411 = vpow2.f32 %v1773_v56 }
 0x4a4   : > { %2413 = vpow2.f32 %v1775_v38 }
 0x4a5   : > { %2415 = vpow2.f32 %v1777_v9 }
 0x4a6   : > { %v3627_v15 = vpop.eup %2405  ;;  %2417 = vpow2.f32 %v1779_v37 }
 0x4a7   : > { %v3629_v1 = vpop.eup %2407  ;;  %2419 = vpow2.f32 %v1781_v13 }
 0x4a8   : > { %v2410_v0 = vpop.eup %2409  ;;  %2421 = vpow2.f32 %v1783_v42  ;;  %v1815_v61 = vrot.slane %v3629_v1, 7 }
 0x4a9   : > { %v2412_v39 = vpop.eup %2411  ;;  %2423 = vpow2.f32 %v1785_v26 }
 0x4aa   : > { %v2414_v11 = vpop.eup %2413  ;;  %v1801_v21 = vrot.slane %v2412_v39, 7  ;;  %v1816_v25 = vsel %vm775_vm6, %v1815_v61, %v3627_v15 }
 0x4ab   : > { %v2416_v17 = vpop.eup %2415  ;;  %v1803_v22 = vrot.slane %v2414_v11, 6  ;;  %v1819_v53 = vsel %vm617_vm0, %v1816_v25, 0.0 }
 0x4ac   : > { %v2418_v62 = vpop.eup %2417  ;;  %v1802_v18 = vsel %vm775_vm6, %v1801_v21, %v2410_v0  ;;  %v1805_v46 = vrot.slane %v2416_v17, 5 }
 0x4ad   : > { %v2420_v33 = vpop.eup %2419  ;;  %v1804_v29 = vsel %vm777_vm7, %v1803_v22, %v1802_v18  ;;  %v1807_v28 = vrot.slane %v2418_v62, 4 }
 0x4ae   : > { %v3634_v55 = vpop.eup %2421  ;;  %v1806_v2 = vsel %vm779_vm8, %v1805_v46, %v1804_v29  ;;  %v1809_v34 = vrot.slane %v2420_v33, 3 }
 0x4af   : > { %v3637_v59 = vpop.eup %2423  ;;  %v1808_v7 = vsel %vm781_vm9, %v1807_v28, %v1806_v2  ;;  %v1811_v47 = vrot.slane %v3634_v55, 2 }
 0x4b0   : > { %v1810_v5 = vsel %vm783_vm10, %v1809_v34, %v1808_v7  ;;  %v1813_v63 = vrot.slane %v3637_v59, 1 }
 0x4b1   : > { %v1812_v16 = vsel %vm785_vm11, %v1811_v47, %v1810_v5 }
 0x4b2   : > { %v1814_v50 = vsel %vm787_vm12, %v1813_v63, %v1812_v16 }
 0x4b3   : > { %v1820_v40 = vadd.f32 %v1819_v53, %v1814_v50  ;;  %v3792_v50 = vld [vmem:[#allocation4_spill] sm:$0xff] }
 0x4b5   : > { %v1821_v60 = vrot.slane %v1820_v40, 4 }
 0x4b7   : > { %v1822_v10 = vadd.f32 %v1821_v60, %v1820_v40 }
 0x4b9   : > { %v1823_v3 = vrot.slane %v1822_v10, 2 }
 0x4bb   : > { %v1824_v49 = vadd.f32 %v1823_v3, %v1822_v10  ;;  %v3793_v10 = vld [vmem:[#allocation6_spill] sm:$0xff] }
 0x4bd   : > { %v1825_v32 = vrot.slane %v1824_v49, 1 }
 0x4bf   : > { %v1826_v8 = vadd.f32 %v1825_v32, %v1824_v49  ;;  %v3794_v32 = vld [vmem:[#allocation5_spill] sm:$0xff] }
 0x4c1   : > { %v1827_v45 = vperm.slane %v1826_v8, 0 }
 0x4c3   : > { %2425 = vrcp.f32 %v1827_v45  ;;  %v1839_v56 = vand.u32 2147483648, %v1827_v45  ;;  %v1837_v38 = vand.u32 2147483647, %v1827_v45  ;;  %vm1833_vm0 = vweird.f32 %v1827_v45 }
 0x4c5   : > { %v1840_v9 = vor.u32 1.1754944e-38, %v1839_v56  ;;  %vm1838_vm2 = vcmp.eq.f32.partialorder %v1837_v38, 8.507059e+37 }
 0x4c9   : > { %v2426_v19 = vpop.eup %2425 }
 0x4ca   : > { %v1829_v12 = vmul.f32 %v2426_v19, %v1827_v45  ;;  %vm1834_vm1 = vweird.f32 %v2426_v19 }
 0x4cb   : > { %vm1835_vm13 = vmor %vm1833_vm0, %vm1834_vm1 }
 0x4cc   : > { %v1830_v41 = vsub.f32 1.0, %v1829_v12 }
 0x4ce   : > { %v1831_v35 = vmul.f32 %v2426_v19, %v1830_v41 }
 0x4d0   : > { %v1832_v57 = vadd.f32 %v2426_v19, %v1831_v35 }
 0x4d2   : > { %v1836_v37 = vsel %vm1835_vm13, %v2426_v19, %v1832_v57 }
 0x4d3   : > { %v1841_v13 = vsel %vm1838_vm2, %v1840_v9, %v1836_v37 }
 0x4d4   : > { %v1843_v42 = vmul.f32 %v2412_v39, %v1841_v13  ;;  %v1842_v26 = vmul.f32 %v2410_v0, %v1841_v13  ;;  %v1844_v29 = vmul.f32 %v2414_v11, %v1841_v13  ;;  %v1846_v25 = vmul.f32 %v2418_v62, %v1841_v13 }
 0x4d5   : > { %v1845_v39 = vmul.f32 %v2416_v17, %v1841_v13  ;;  %v1847_v7 = vmul.f32 %v2420_v33, %v1841_v13  ;;  %v1849_v17 = vmul.f32 %v3637_v59, %v1841_v13  ;;  %v1848_v62 = vmul.f32 %v3634_v55, %v1841_v13  ;;  %v3790_v55 = vld [vmem:[#allocation2_spill] sm:$0xff] }
 0x4d6   : > { %v1853_v21 = vperm.slane %v1843_v42, 0  ;;  %v1852_v61 = vperm.slane %v1842_v26, 0  ;;  %v1854_v28 = vperm.slane %v1844_v29, 0  ;;  %v1850_v63 = vmul.f32 %v3627_v15, %v1841_v13 }
 0x4d7   : > { %v1851_v53 = vmul.f32 %v3629_v1, %v1841_v13 }
 0x4d8   : > { %v1864_v22 = vmul.f32 %v1853_v21, %v2671_v14  ;;  %v1863_v18 = vmul.f32 %v1852_v61, %v2807_v52  ;;  %v1862_v46 = vmul.f32 %v1852_v61, %v2689_v30  ;;  %v1867_v2 = vmul.f32 %v1854_v28, %v2749_v4 }
 0x4d9   : > { %v1866_v34 = vmul.f32 %v1854_v28, %v2625_v43  ;;  %v1865_v0 = vmul.f32 %v1853_v21, %v2770_v24  ;;  %v1856_v14 = vperm.slane %v1846_v25, 0  ;;  %v1855_v52 = vperm.slane %v1845_v39, 0 }
 0x4da   : > { %1886 = vadd.xlane.f32.xlu2 %v1864_v22  ;;  %1884 = vadd.xlane.f32.xlu0 %v1863_v18  ;;  %v1857_v43 = vperm.slane %v1847_v7, 0 }
 0x4db   : > { %1882 = vadd.xlane.f32.xlu1 %v1862_v46  ;;  %v1870_v30 = vmul.f32 %v1856_v14, %v2842_v20  ;;  %v1869_v11 = vmul.f32 %v1855_v52, %v2888_v58  ;;  %v1868_v47 = vmul.f32 %v1855_v52, %v2924_v27  ;;  %v1871_v5 = vmul.f32 %v1856_v14, %v3032_v54  ;;  %v3791_v54 = vld [vmem:[#allocation3_spill] sm:$0xff] }
 0x4dc   : > { %v1873_v4 = vmul.f32 %v1857_v43, %v2970_v48  ;;  %v1872_v24 = vmul.f32 %v1857_v43, %v2996_v31  ;;  %v1859_v20 = vperm.slane %v1849_v17, 0  ;;  %v1858_v58 = vperm.slane %v1848_v62, 0 }
 0x4dd   : > { %v1860_v31 = vperm.slane %v1850_v63, 0 }
 0x4de   : > { %v1876_v27 = vmul.f32 %v1859_v20, %v3068_v36  ;;  %v1875_v33 = vmul.f32 %v1858_v58, %v3104_v6  ;;  %v1874_v48 = vmul.f32 %v1858_v58, %v3150_v51  ;;  %v1877_v40 = vmul.f32 %v1859_v20, %v3792_v50 }
 0x4df   : > { %v1879_v59 = vmul.f32 %v1860_v31, %v3790_v55  ;;  %v1878_v16 = vmul.f32 %v1860_v31, %v3791_v54  ;;  %v1861_v36 = vperm.slane %v1851_v53, 0 }
 0x4e1   : > { %v1881_v6 = vmul.f32 %v1861_v36, %v3228_v44  ;;  %v1880_v51 = vmul.f32 %v1861_v36, %v3233_v23 }
 0x4e2   : > { %1892 = vadd.xlane.f32.xlu2 %v1867_v2  ;;  %1890 = vadd.xlane.f32.xlu0 %v1866_v34 }
 0x4e3   : > { %1888 = vadd.xlane.f32.xlu1 %v1865_v0 }
 0x4ea   : > { %1898 = vadd.xlane.f32.xlu2 %v1870_v30  ;;  %1896 = vadd.xlane.f32.xlu0 %v1869_v11 }
 0x4eb   : > { %1894 = vadd.xlane.f32.xlu1 %v1868_v47 }
 0x4f2   : > { %1904 = vadd.xlane.f32.xlu2 %v1873_v4  ;;  %1902 = vadd.xlane.f32.xlu0 %v1872_v24 }
 0x4f3   : > { %1900 = vadd.xlane.f32.xlu1 %v1871_v5 }
 0x4fa   : > { %1910 = vadd.xlane.f32.xlu2 %v1876_v27  ;;  %1908 = vadd.xlane.f32.xlu0 %v1875_v33 }
 0x4fb   : > { %1906 = vadd.xlane.f32.xlu1 %v1874_v48 }
 0x502   : > { %1916 = vadd.xlane.f32.xlu2 %v1879_v59  ;;  %1914 = vadd.xlane.f32.xlu0 %v1878_v16 }
 0x503   : > { %1912 = vadd.xlane.f32.xlu1 %v1877_v40 }
 0x50a   : > { %1920 = vadd.xlane.f32.xlu0 %v1881_v6 }
 0x50b   : > { %1918 = vadd.xlane.f32.xlu1 %v1880_v51 }
 0x54d   : > { %v1887_v15 = vpop.xlane.xlu2 %1886  ;;  %v1885_v60 = vpop.xlane.xlu0 %1884 }
 0x54e   : > { %v2085_v3 = vperm.slane %v1885_v60, %v3793_v10  ;;  %v1883_v49 = vpop.xlane.xlu1 %1882  ;;  %v2087_v23 = vperm.slane %v1887_v15, %v3794_v32  ;;  %v1924_v25 = vmul.f32 %v1887_v15, %v1887_v15  ;;  %v1923_v14 = vmul.f32 %v1885_v60, %v1885_v60 }
 0x54f   : > { %v2084_v8 = vperm.slane %v1883_v49, %v3794_v32  ;;  %v1922_v52 = vmul.f32 %v1883_v49, %v1883_v49 }
 0x550   : > { %v1965_v24 = vperm.slane %v1924_v25, %v3794_v32  ;;  %v1963_v20 = vperm.slane %v1923_v14, %v3793_v10 }
 0x551   : > { %v2086_v1 = vsel %vm746_vm5, %v2085_v3, %v2084_v8  ;;  %v1962_v58 = vperm.slane %v1922_v52, %v3794_v32 }
 0x553   : > { %v1964_v51 = vsel %vm746_vm5, %v1963_v20, %v1962_v58 }
 0x555   : > { %v1893_v45 = vpop.xlane.xlu2 %1892  ;;  %v1891_v19 = vpop.xlane.xlu0 %1890 }
 0x556   : > { %v2091_v12 = vperm.slane %v1893_v45, %v3793_v10  ;;  %v2090_v41 = vperm.slane %v1891_v19, %v3794_v32  ;;  %v1889_v44 = vpop.xlane.xlu1 %1888  ;;  %v1927_v11 = vmul.f32 %v1893_v45, %v1893_v45  ;;  %v1926_v7 = vmul.f32 %v1891_v19, %v1891_v19 }
 0x557   : > { %v2088_v56 = vperm.slane %v1889_v44, %v3793_v10  ;;  %v1925_v18 = vmul.f32 %v1889_v44, %v1889_v44 }
 0x558   : > { %v2092_v35 = vsel %vm746_vm5, %v2091_v12, %v2090_v41  ;;  %v1969_v33 = vperm.slane %v1927_v11, %v3793_v10  ;;  %v1968_v63 = vperm.slane %v1926_v7, %v3794_v32 }
 0x559   : > { %v2089_v38 = vsel %vm746_vm5, %v2088_v56, %v2087_v23  ;;  %v1966_v47 = vperm.slane %v1925_v18, %v3793_v10 }
 0x55a   : > { %v2114_v57 = vsel %vm775_vm6, %v2089_v38, %v2086_v1  ;;  %v1970_v49 = vsel %vm746_vm5, %v1969_v33, %v1968_v63 }
 0x55b   : > { %v2115_v9 = vsel %vm777_vm7, %v2092_v35, %v2114_v57  ;;  %v1967_v48 = vsel %vm746_vm5, %v1966_v47, %v1965_v24 }
 0x55c   : > { %v1992_v8 = vsel %vm775_vm6, %v1967_v48, %v1964_v51 }
 0x55d   : > { %v1899_v37 = vpop.xlane.xlu2 %1898  ;;  %v1897_v13 = vpop.xlane.xlu0 %1896 }
 0x55e   : > { %v2094_v42 = vperm.slane %v1897_v13, %v3793_v10  ;;  %v1895_v26 = vpop.xlane.xlu1 %1894  ;;  %v2096_v39 = vperm.slane %v1899_v37, %v3794_v32  ;;  %v1929_v17 = vmul.f32 %v1897_v13, %v1897_v13  ;;  %v1930_v55 = vmul.f32 %v1899_v37, %v1899_v37 }
 0x55f   : > { %v2093_v21 = vperm.slane %v1895_v26, %v3794_v32  ;;  %v1928_v62 = vmul.f32 %v1895_v26, %v1895_v26 }
 0x560   : > { %v1972_v40 = vperm.slane %v1929_v17, %v3793_v10  ;;  %v1974_v45 = vperm.slane %v1930_v55, %v3794_v32 }
 0x561   : > { %v2095_v61 = vsel %vm746_vm5, %v2094_v42, %v2093_v21  ;;  %v1971_v36 = vperm.slane %v1928_v62, %v3794_v32 }
 0x562   : > { %v2116_v22 = vsel %vm779_vm8, %v2095_v61, %v2115_v9  ;;  %v1993_v9 = vsel %vm777_vm7, %v1970_v49, %v1992_v8  ;;  %vm3795_vm7 = vcmask 130048  }
 0x563   : > { %v1973_v44 = vsel %vm746_vm5, %v1972_v40, %v1971_v36  ;;  %vm3797_vm15 = vmmov %vm3795_vm7 }
 0x564   : > { %v1994_v42 = vsel %vm779_vm8, %v1973_v44, %v1993_v9  ;;  %vm3796_vm8 = vcmask 123904  }
 0x565   : > { %v1905_v46 = vpop.xlane.xlu2 %1904  ;;  %v1903_v29 = vpop.xlane.xlu0 %1902  ;;  %vm3798_vm2 = vmmov %vm3796_vm8 }
 0x566   : > { %v2100_v28 = vperm.slane %v1905_v46, %v3793_v10  ;;  %v2099_v2 = vperm.slane %v1903_v29, %v3794_v32  ;;  %v1901_v34 = vpop.xlane.xlu1 %1900  ;;  %v1933_v59 = vmul.f32 %v1905_v46, %v1905_v46  ;;  %v1932_v54 = vmul.f32 %v1903_v29, %v1903_v29 }
 0x567   : > { %v2097_v0 = vperm.slane %v1901_v34, %v3793_v10  ;;  %v1931_v27 = vmul.f32 %v1901_v34, %v1901_v34 }
 0x568   : > { %v2101_v30 = vsel %vm746_vm5, %v2100_v28, %v2099_v2  ;;  %v1978_v19 = vperm.slane %v1933_v59, %v3793_v10  ;;  %v1977_v12 = vperm.slane %v1932_v54, %v3794_v32 }
 0x569   : > { %v2098_v43 = vsel %vm746_vm5, %v2097_v0, %v2096_v39  ;;  %v1975_v15 = vperm.slane %v1931_v27, %v3793_v10 }
 0x56a   : > { %v2117_v4 = vsel %vm781_vm9, %v2098_v43, %v2116_v22  ;;  %v1979_v13 = vsel %vm746_vm5, %v1978_v19, %v1977_v12 }
 0x56b   : > { %v2118_v5 = vsel %vm783_vm10, %v2101_v30, %v2117_v4  ;;  %v1976_v23 = vsel %vm746_vm5, %v1975_v15, %v1974_v45 }
 0x56c   : > { %v1995_v22 = vsel %vm781_vm9, %v1976_v23, %v1994_v42 }
 0x56d   : > { %v1909_v31 = vpop.xlane.xlu0 %1908  ;;  %v1911_v16 = vpop.xlane.xlu2 %1910  ;;  %v1996_v25 = vsel %vm783_vm10, %v1979_v13, %v1995_v22 }
 0x56e   : > { %v2103_v53 = vperm.slane %v1909_v31, %v3793_v10  ;;  %v1907_v50 = vpop.xlane.xlu1 %1906  ;;  %v1935_v60 = vmul.f32 %v1909_v31, %v1909_v31  ;;  %v1936_v38 = vmul.f32 %v1911_v16, %v1911_v16  ;;  %v2105_v26 = vperm.slane %v1911_v16, %v3794_v32 }
 0x56f   : > { %v2102_v6 = vperm.slane %v1907_v50, %v3794_v32  ;;  %v1934_v3 = vmul.f32 %v1907_v50, %v1907_v50 }
 0x570   : > { %v1981_v56 = vperm.slane %v1935_v60, %v3793_v10  ;;  %v1983_v29 = vperm.slane %v1936_v38, %v3794_v32 }
 0x571   : > { %v2104_v1 = vsel %vm746_vm5, %v2103_v53, %v2102_v6  ;;  %v1980_v35 = vperm.slane %v1934_v3, %v3794_v32 }
 0x572   : > { %v2119_v41 = vsel %vm785_vm11, %v2104_v1, %v2118_v5 }
 0x573   : > { %v1982_v46 = vsel %vm746_vm5, %v1981_v56, %v1980_v35 }
 0x574   : > { %v1997_v52 = vsel %vm785_vm11, %v1982_v46, %v1996_v25 }
 0x575   : > { %v1915_v57 = vpop.xlane.xlu0 %1914  ;;  %v1917_v18 = vpop.xlane.xlu2 %1916 }
 0x576   : > { %v1913_v37 = vpop.xlane.xlu1 %1912  ;;  %v1939_v39 = vmul.f32 %v1917_v18, %v1917_v18  ;;  %v1938_v0 = vmul.f32 %v1915_v57, %v1915_v57  ;;  %v2109_v11 = vperm.slane %v1917_v18, %v3793_v10  ;;  %v2108_v7 = vperm.slane %v1915_v57, %v3794_v32 }
 0x577   : > { %v1937_v21 = vmul.f32 %v1913_v37, %v1913_v37  ;;  %v2106_v61 = vperm.slane %v1913_v37, %v3793_v10 }
 0x578   : > { %v1987_v62 = vperm.slane %v1939_v39, %v3793_v10  ;;  %v1986_v5 = vperm.slane %v1938_v0, %v3794_v32  ;;  %v2110_v33 = vsel %vm746_vm5, %v2109_v11, %v2108_v7 }
 0x579   : > { %v1984_v28 = vperm.slane %v1937_v21, %v3793_v10  ;;  %v2107_v2 = vsel %vm746_vm5, %v2106_v61, %v2105_v26 }
 0x57a   : > { %v3730_v34 = vsel %vm787_vm12, %v2107_v2, %v2119_v41  ;;  %v1988_v55 = vsel %vm746_vm5, %v1987_v62, %v1986_v5 }
 0x57b   : > { %v1985_v14 = vsel %vm746_vm5, %v1984_v28, %v1983_v29 }
 0x57c   : > { %v1998_v30 = vsel %vm787_vm12, %v1985_v14, %v1997_v52 }
 0x57d   : > { %v1921_v47 = vpop.xlane.xlu0 %1920  ;;  %v2002_v43 = vsel %vm3795_vm7, %v1998_v30, 0.0 }
 0x57e   : > { %v1941_v4 = vmul.f32 %v1921_v47, %v1921_v47  ;;  %v2112_v24 = vperm.slane %v1921_v47, %v3793_v10  ;;  %2003 = vadd.xlane.f32.xlu2 %v2002_v43  ;;  %v1919_v17 = vpop.xlane.xlu1 %1918 }
 0x57f   : > { %v1940_v20 = vmul.f32 %v1919_v17, %v1919_v17  ;;  %v2111_v58 = vperm.slane %v1919_v17, %v3794_v32 }
 0x580   : > { %v1990_v27 = vperm.slane %v1941_v4, %v3793_v10 }
 0x581   : > { %v1989_v63 = vperm.slane %v1940_v20, %v3794_v32  ;;  %v2113_v48 = vsel %vm746_vm5, %v2112_v24, %v2111_v58 }
 0x582   : > { %v3748_v31 = vsel %vm775_vm6, %v2113_v48, %v2110_v33 }
 0x583   : > { %v1991_v59 = vsel %vm746_vm5, %v1990_v27, %v1989_v63 }
 0x584   : > { %v1999_v54 = vsel %vm775_vm6, %v1991_v59, %v1988_v55 }
 0x585   : > { %v2005_v16 = vsel %vm3796_vm8, %v1999_v54, 0.0 }
 0x586   : > { %2006 = vadd.xlane.f32.xlu1 %v2005_v16 }
 0x5f1   : > { %v2004_v53 = vpop.xlane.xlu2 %2003 }
 0x5f2   : > { %2427 = vrsqrt.f32 %v2004_v53  ;;  %v2032_v10 = vadd.f32 1.0, %v2004_v53  ;;  %vm2015_vm9 = vcmp.eq.f32.partialorder %v2004_v53, inf  ;;  %v2018_v38 = vand.u32 2147483648, %v2004_v53 }
 0x5f3   : > { %vm2017_vm11 = vcmp.eq.f32.partialorder %v2004_v53, 0.0 }
 0x5f4   : > { %2429 = vrcp.f32 %v2032_v10  ;;  %v2045_v45 = vand.u32 2147483648, %v2032_v10  ;;  %v2043_v12 = vand.u32 2147483647, %v2032_v10  ;;  %vm2039_vm6 = vweird.f32 %v2032_v10 }
 0x5f6   : > { %v2046_v9 = vor.u32 1.1754944e-38, %v2045_v45  ;;  %vm2044_vm12 = vcmp.eq.f32.partialorder %v2043_v12, 8.507059e+37 }
 0x5f8   : > { %v2428_v50 = vpop.eup %2427 }
 0x5f9   : > { %v2009_v32 = vmul.f32 %v2428_v50, %v2004_v53  ;;  %v2007_v40 = vpop.xlane.xlu1 %2006 }
 0x5fa   : > { %2431 = vrsqrt.f32 %v2007_v40  ;;  %v2430_v36 = vpop.eup %2429  ;;  %v2033_v51 = vadd.f32 1.0, %v2007_v40  ;;  %vm2027_vm1 = vcmp.eq.f32.partialorder %v2007_v40, inf  ;;  %v2030_v14 = vand.u32 2147483648, %v2007_v40 }
 0x5fb   : > { %v2010_v6 = vmul.f32 %v2428_v50, %v2009_v32  ;;  %v2035_v15 = vmul.f32 %v2430_v36, %v2032_v10  ;;  %vm2040_vm5 = vweird.f32 %v2430_v36  ;;  %vm2029_vm0 = vcmp.eq.f32.partialorder %v2007_v40, 0.0 }
 0x5fc   : > { %2433 = vrcp.f32 %v2033_v51  ;;  %vm2041_vm10 = vmor %vm2039_vm6, %vm2040_vm5  ;;  %v2060_v29 = vand.u32 2147483648, %v2033_v51  ;;  %v2058_v25 = vand.u32 2147483647, %v2033_v51  ;;  %vm2054_vm4 = vweird.f32 %v2033_v51 }
 0x5fd   : > { %v2011_v60 = vmul.f32 0.5, %v2010_v6  ;;  %v2036_v3 = vsub.f32 1.0, %v2035_v15 }
 0x5fe   : > { %v2061_v30 = vor.u32 1.1754944e-38, %v2060_v29  ;;  %vm2059_vm13 = vcmp.eq.f32.partialorder %v2058_v25, 8.507059e+37 }
 0x5ff   : > { %v2012_v49 = vsub.f32 1.5, %v2011_v60  ;;  %v2037_v1 = vmul.f32 %v2430_v36, %v2036_v3 }
 0x600   : > { %v2432_v8 = vpop.eup %2431 }
 0x601   : > { %v2013_v19 = vmul.f32 %v2428_v50, %v2012_v49  ;;  %v2021_v41 = vmul.f32 %v2432_v8, %v2007_v40  ;;  %v2038_v44 = vadd.f32 %v2430_v36, %v2037_v1 }
 0x602   : > { %v2434_v23 = vpop.eup %2433 }
 0x603   : > { %v2014_v56 = vmul.f32 %v2013_v19, %v2004_v53  ;;  %v2022_v35 = vmul.f32 %v2432_v8, %v2021_v41  ;;  %v2042_v57 = vsel %vm2041_vm10, %v2430_v36, %v2038_v44  ;;  %v2050_v37 = vmul.f32 %v2434_v23, %v2033_v51 }
 0x604   : > { %v2047_v21 = vsel %vm2044_vm12, %v2046_v9, %v2042_v57  ;;  %vm2055_vm3 = vweird.f32 %v2434_v23 }
 0x605   : > { %v2016_v13 = vsel %vm2015_vm9, %v2004_v53, %v2014_v56  ;;  %v2023_v42 = vmul.f32 0.5, %v2022_v35  ;;  %v2051_v61 = vsub.f32 1.0, %v2050_v37  ;;  %vm2056_vm14 = vmor %vm2054_vm4, %vm2055_vm3 }
 0x606   : > { %v2019_v26 = vsel %vm2017_vm11, %v2018_v38, %v2016_v13 }
 0x607   : > { %v2048_v22 = vmul.f32 %v2047_v21, %v2019_v26  ;;  %v2024_v18 = vsub.f32 1.5, %v2023_v42  ;;  %v2052_v46 = vmul.f32 %v2434_v23, %v2051_v61 }
 0x609   : > { %v2124_v28 = vmul.f32 %v3730_v34, %v2048_v22  ;;  %v2025_v2 = vmul.f32 %v2432_v8, %v2024_v18  ;;  %v2053_v39 = vadd.f32 %v2434_v23, %v2052_v46 }
 0x60b   : > { %2126 = vst.msk [vmem:[%s140_s26] sm:$0xff] %vm3797_vm15, %v2124_v28  ;;  %v2026_v0 = vmul.f32 %v2025_v2, %v2007_v40  ;;  %v2057_v52 = vsel %vm2056_vm14, %v2434_v23, %v2053_v39 }
 0x60c   : > { %v2062_v47 = vsel %vm2059_vm13, %v2061_v30, %v2057_v52 }
 0x60d   : > { %v2028_v11 = vsel %vm2027_vm1, %v2007_v40, %v2026_v0 }
 0x60e   : > { %v2031_v7 = vsel %vm2029_vm0, %v2030_v14, %v2028_v11 }
 0x60f   : > { %v2063_v43 = vmul.f32 %v2062_v47, %v2031_v7 }
 0x611   : > { %v2125_v34 = vmul.f32 %v3748_v31, %v2063_v43 }
 0x613   : > { %2127 = vst.msk [vmem:[%s140_s26 + $0x8] sm:$0x3] %vm3798_vm2, %v2125_v34 }
 0x614 PF: > { %s12_s9 = sadd.s32 1, %s2441_s9  }
 0x615   : > { %p9_p4 = scmp.ge.s32.totalorder %s12_s9, 4  }
 0x617   :  { %11 = sbr.rel (!%p9_p4) target bundleno = 1 (0x1), region = 65 }

</bundles_post_ra>
